<compile_context>
chip_gen: v6e
topology: v6e:2x2x1
jax: 0.10.0
libtpu: 0.0.40
codegen_flags: <defaults>
</compile_context>

<pallas_src>
import functools
import math

import jax
import jax.numpy as jnp
import numpy as np
from jax import lax
from jax.experimental import pallas as pl
from jax.experimental.pallas import tpu as pltpu

# Make the XLA reference matmuls full-f32 so the correctness check can be tight.
jax.config.update("jax_default_matmul_precision", "float32")

RELU_LEAK = 0.01  # negative slope of the LeakyReLU in the Decoder head


# --------------------------------------------------------------------------
# Fused Decoder kernel: GRU recurrence + fc1 / leaky_relu / fc2 head
# --------------------------------------------------------------------------
def _gru_head_body(gi_all, h0_ref, whh_ref, bhh_ref,
                   w1_ref, b1_ref, w2_ref, b2_ref,
                   out_ref, hf_ref, seq_scr, *, T, B):
    """Shared body: T-step recurrence, then a batched MLP head.

    gi_all  : (T*B, 3H) value — precomputed x @ W_ih^T + b_ih (time-major)
    h0_ref  : (B, H)    initial hidden state
    whh_ref : (H, 3H)   hidden weights (pre-transposed); bhh_ref (1, 3H)
    w1_ref  : (H, Hh)   fc1 (pre-transposed); b1_ref (1, Hh)
    w2_ref  : (Hh, Cp)  fc2, zero-padded to lane-dense Cp; b2_ref (1, Cp)
    out_ref : (T*B, Cp) head output (lane-dense)
    hf_ref  : (B, H)    final hidden state (written exactly once)
    seq_scr : (T*B, H)  VMEM scratch holding the hidden-state sequence
    """
    H = h0_ref.shape[-1]
    whh = whh_ref[...]
    bhh = bhh_ref[...]

    h = h0_ref[...]
    # Statically unrolled recurrence: only h @ W_hh sits on the serial path.
    for t in range(T):
        gh = jnp.dot(h, whh, preferred_element_type=jnp.float32) + bhh
        gi_t = gi_all[t * B:(t + 1) * B, :]
        r = jax.nn.sigmoid(gi_t[:, 0 * H:1 * H] + gh[:, 0 * H:1 * H])
        z = jax.nn.sigmoid(gi_t[:, 1 * H:2 * H] + gh[:, 1 * H:2 * H])
        n = jnp.tanh(gi_t[:, 2 * H:3 * H] + r * gh[:, 2 * H:3 * H])
        h = (1.0 - z) * n + z * h
        seq_scr[t * B:(t + 1) * B, :] = h

    hf_ref[...] = h  # single final-state write

    # Batched MLP head over the whole (T*B, H) sequence, straight from VMEM.
    hid = jnp.dot(seq_scr[...], w1_ref[...],
                  preferred_element_type=jnp.float32) + b1_ref[...]
    hid = jnp.where(hid >= 0.0, hid, RELU_LEAK * hid)  # leaky_relu; dropout p=0.0
    out_ref[...] = jnp.dot(hid, w2_ref[...],
                           preferred_element_type=jnp.float32) + b2_ref[...]


def decoder_kernel(x_ref, h0_ref, wih_ref, bih_ref, whh_ref, bhh_ref,
                   w1_ref, b1_ref, w2_ref, b2_ref,
                   out_ref, hf_ref, seq_scr, *, T, B):
    # Hoisted input projection: one MXU matmul covers every timestep.
    gi_all = jnp.dot(x_ref[...], wih_ref[...],
                     preferred_element_type=jnp.float32) + bih_ref[...]
    _gru_head_body(gi_all, h0_ref, whh_ref, bhh_ref, w1_ref, b1_ref,
                   w2_ref, b2_ref, out_ref, hf_ref, seq_scr, T=T, B=B)


def decoder_kernel_empty_input(h0_ref, bih_ref, whh_ref, bhh_ref,
                               w1_ref, b1_ref, w2_ref, b2_ref,
                               out_ref, hf_ref, seq_scr, *, T, B):
    # empty_input: x is all zeros -> gi is just the input bias (no matmul/DMA).
    gi_all = jnp.broadcast_to(bih_ref[...], (T * B, bih_ref.shape[-1]))
    _gru_head_body(gi_all, h0_ref, whh_ref, bhh_ref, w1_ref, b1_ref,
                   w2_ref, b2_ref, out_ref, hf_ref, seq_scr, T=T, B=B)


# --------------------------------------------------------------------------
# Wrapper (one pallas_call per forward)
# --------------------------------------------------------------------------
def decoder_forward(params, inputs, states, last_value):
    """Pallas-backed Decoder.forward.

    inputs     : (B, T, input_size)  (input_size may be 0 -> empty_input)
    states     : (1, B, core_size)   torch.nn.GRU hidden-state layout
    last_value : accepted but unused (the module overwrites `out = last_value`)
    returns (out (B, T, out_size), states (1, B, core_size))
    """
    del last_value
    B, T, Fin = inputs.shape
    h0 = states[0]                      # (B, H)
    H = h0.shape[-1]

    g = params["gru"]
    wih, whh, bih, bhh = g["wih"], g["whh"], g["bih"], g["bhh"]
    w1, b1 = params["fc1"]["w"], params["fc1"]["b"]
    w2, b2 = params["fc2"]["w"], params["fc2"]["b"]
    Hh = w1.shape[1]
    out_size = w2.shape[1]

    # Lane-dense head output: zero-pad fc2 columns to a multiple of 128 and
    # slice back after the kernel (wrapper-side layout plumbing is free).
    C_pad = max(128, pl.cdiv(out_size, 128) * 128)
    w2p = jnp.zeros((Hh, C_pad), jnp.float32).at[:, :out_size].set(w2)
    b2p = jnp.zeros((1, C_pad), jnp.float32).at[:, :out_size].set(b2)

    vmem = pl.BlockSpec(memory_space=pltpu.MemorySpace.VMEM)
    out_shape = (jax.ShapeDtypeStruct((T * B, C_pad), jnp.float32),
                 jax.ShapeDtypeStruct((B, H), jnp.float32))
    scratch = [pltpu.VMEM((T * B, H), jnp.float32)]

    if params["empty_input"]:
        kern = functools.partial(decoder_kernel_empty_input, T=T, B=B)
        args = (h0, bih, whh, bhh, w1, b1, w2p, b2p)
        flops = 2 * T * B * (H * 3 * H + H * Hh + Hh * C_pad)
    else:
        # Time-major, flattened so one matmul computes gi for every timestep.
        x_tm = jnp.transpose(inputs, (1, 0, 2)).reshape(T * B, Fin)
        kern = functools.partial(decoder_kernel, T=T, B=B)
        args = (x_tm, h0, wih, bih, whh, bhh, w1, b1, w2p, b2p)
        flops = 2 * T * B * (Fin * 3 * H + H * 3 * H + H * Hh + Hh * C_pad)

    bytes_accessed = 4 * (sum(int(np.prod(a.shape)) for a in args)
                          + T * B * C_pad + B * H)

    out_pad, h_final = pl.pallas_call(
        kern,
        out_shape=out_shape,
        in_specs=[vmem] * len(args),
        out_specs=(vmem, vmem),
        scratch_shapes=scratch,
        cost_estimate=pl.CostEstimate(flops=flops,
                                      transcendentals=3 * T * B * H,
                                      bytes_accessed=bytes_accessed),
    )(*args)

    out = out_pad[:, :out_size].reshape(T, B, out_size).transpose(1, 0, 2)
    return out, h_final[None, :, :]


# --------------------------------------------------------------------------
# Parameter init (torch-style uniform init; weights stored pre-transposed)
# --------------------------------------------------------------------------
def _uniform(key, shape, scale):
    return jax.random.uniform(key, shape, jnp.float32, -scale, scale)


def init_decoder_params(key, input_size, hidden_size, core_size, out_size=1):
    """Mirrors Decoder.__init__ (torch.nn.GRU core, core_layers=1, two Linears).
    Stored pre-transposed: wih (F, 3H), whh (H, 3H), fc w (in, out)."""
    empty_input = input_size == 0
    gru_in = 1 if empty_input else input_size
    kg, k1, k2 = jax.random.split(key, 3)
    kg0, kg1, kg2, kg3 = jax.random.split(kg, 4)
    sg = 1.0 / math.sqrt(core_size)
    gru = {
        "wih": _uniform(kg0, (gru_in, 3 * core_size), sg),
        "whh": _uniform(kg1, (core_size, 3 * core_size), sg),
        "bih": _uniform(kg2, (1, 3 * core_size), sg),
        "bhh": _uniform(kg3, (1, 3 * core_size), sg),
    }
    k1w, k1b = jax.random.split(k1)
    k2w, k2b = jax.random.split(k2)
    s1 = 1.0 / math.sqrt(core_size)
    s2 = 1.0 / math.sqrt(hidden_size)
    return {
        "empty_input": empty_input,
        "gru": gru,
        "fc1": {"w": _uniform(k1w, (core_size, hidden_size), s1),
                "b": _uniform(k1b, (1, hidden_size), s1)},
        "fc2": {"w": _uniform(k2w, (hidden_size, out_size), s2),
                "b": _uniform(k2b, (1, out_size), s2)},
    }


# --------------------------------------------------------------------------
# Pure-JAX reference (for correctness checks)
# --------------------------------------------------------------------------
def decoder_ref(params, inputs, states, last_value):
    del last_value
    B, T, _ = inputs.shape
    h0 = states[0]
    H = h0.shape[-1]
    g = params["gru"]
    x = jnp.zeros((B, T, 1), jnp.float32) if params["empty_input"] else inputs

    def step(h, x_t):
        gi = x_t @ g["wih"] + g["bih"]
        gh = h @ g["whh"] + g["bhh"]
        r = jax.nn.sigmoid(gi[:, :H] + gh[:, :H])
        z = jax.nn.sigmoid(gi[:, H:2 * H] + gh[:, H:2 * H])
        n = jnp.tanh(gi[:, 2 * H:] + r * gh[:, 2 * H:])
        h_new = (1.0 - z) * n + z * h
        return h_new, h_new

    hf, ys = lax.scan(step, h0, jnp.transpose(x, (1, 0, 2)))
    seq = jnp.transpose(ys, (1, 0, 2))
    hid = seq @ params["fc1"]["w"] + params["fc1"]["b"]
    hid = jnp.where(hid >= 0.0, hid, RELU_LEAK * hid)
    out = hid @ params["fc2"]["w"] + params["fc2"]["b"]
    return out, hf[None, :, :]


# --------------------------------------------------------------------------
# main
# --------------------------------------------------------------------------
if __name__ == "__main__":
    key = jax.random.PRNGKey(0)
    k_params, k_params0, k_x, k_h, k_h0, k_lv = jax.random.split(key, 6)

    # --- Decoder with real (future metadata) inputs -----------------------
    B, T = 2, 8
    input_size, hidden_size, core_size, out_size = 5, 14, 9, 2
    params = init_decoder_params(k_params, input_size, hidden_size,
                                 core_size, out_size)

    inputs = jax.random.normal(k_x, (B, T, input_size), jnp.float32)
    states = jax.random.normal(k_h, (1, B, core_size), jnp.float32)
    last_value = jax.random.normal(k_lv, (B, out_size), jnp.float32)

    out, st = decoder_forward(params, inputs, states, last_value)
    jax.block_until_ready((out, st))

    out_r, st_r = decoder_ref(params, inputs, states, last_value)
    np.testing.assert_allclose(np.asarray(out), np.asarray(out_r),
                               rtol=1e-4, atol=1e-5)
    np.testing.assert_allclose(np.asarray(st), np.asarray(st_r),
                               rtol=1e-4, atol=1e-5)
    assert out.shape == (B, T, out_size)
    assert st.shape == (1, B, core_size)

    # --- empty_input Decoder (input_size == 0, e.g. the auto/recon head) --
    T0 = 6
    params0 = init_decoder_params(k_params0, 0, hidden_size, core_size, 1)
    inputs0 = jnp.zeros((B, T0, 0), jnp.float32)
    states0 = jax.random.normal(k_h0, (1, B, core_size), jnp.float32)

    out0, st0 = decoder_forward(params0, inputs0, states0, last_value)
    jax.block_until_ready((out0, st0))

    out0_r, st0_r = decoder_ref(params0, inputs0, states0, last_value)
    np.testing.assert_allclose(np.asarray(out0), np.asarray(out0_r),
                               rtol=1e-4, atol=1e-5)
    np.testing.assert_allclose(np.asarray(st0), np.asarray(st0_r),
                               rtol=1e-4, atol=1e-5)
    assert out0.shape == (B, T0, 1)
    assert st0.shape == (1, B, core_size)

    # TODO(synk): on v7x, two independent Decoder branches (auto/future) could
    # be dispatched to the two TensorCores via a leading 'parallel' grid axis.
    print("KERNEL_OK")
</pallas_src>

<mosaic_0001>
module attributes {stable_mosaic.version = 11 : i64} {
  func.func @decoder_kernel(%arg0: memref<16x5xf32, #tpu.memory_space<vmem>>, %arg1: memref<2x9xf32, #tpu.memory_space<vmem>>, %arg2: memref<5x27xf32, #tpu.memory_space<vmem>>, %arg3: memref<1x27xf32, #tpu.memory_space<vmem>>, %arg4: memref<9x27xf32, #tpu.memory_space<vmem>>, %arg5: memref<1x27xf32, #tpu.memory_space<vmem>>, %arg6: memref<9x14xf32, #tpu.memory_space<vmem>>, %arg7: memref<1x14xf32, #tpu.memory_space<vmem>>, %arg8: memref<14x128xf32, #tpu.memory_space<vmem>>, %arg9: memref<1x128xf32, #tpu.memory_space<vmem>>, %arg10: memref<16x128xf32, #tpu.memory_space<vmem>>, %arg11: memref<2x9xf32, #tpu.memory_space<vmem>>, %arg12: memref<16x9xf32, #tpu.memory_space<vmem>>) attributes {dimension_semantics = [], scalar_prefetch = 0 : i64, scratch_operands = 1 : i64, tpu.core_type = #tpu.core_type<tc>} {
    %c0 = arith.constant 0 : index
    %c0_0 = arith.constant 0 : index
    %0 = vector.load %arg0[%c0, %c0_0] : memref<16x5xf32, #tpu.memory_space<vmem>>, vector<16x5xf32>
    %c0_1 = arith.constant 0 : index
    %c0_2 = arith.constant 0 : index
    %1 = vector.load %arg2[%c0_1, %c0_2] : memref<5x27xf32, #tpu.memory_space<vmem>>, vector<5x27xf32>
    %cst = arith.constant dense<0.000000e+00> : vector<16x27xf32>
    %2 = tpu.matmul %0, %1, %cst {dimension_numbers = #tpu.dot_dimension_numbers<[1], [0], [0], [1], [0, 0, 1, 1], [], []>, precision = #tpu.contract_precision<fp32>} : vector<16x5xf32>, vector<5x27xf32>, vector<16x27xf32> -> vector<16x27xf32>
    %c0_3 = arith.constant 0 : index
    %c0_4 = arith.constant 0 : index
    %3 = vector.load %arg3[%c0_3, %c0_4] : memref<1x27xf32, #tpu.memory_space<vmem>>, vector<1x27xf32>
    %4 = vector.broadcast %3 : vector<1x27xf32> to vector<16x27xf32>
    %5 = arith.addf %2, %4 : vector<16x27xf32>
    %c0_5 = arith.constant 0 : index
    %c0_6 = arith.constant 0 : index
    %6 = vector.load %arg4[%c0_5, %c0_6] : memref<9x27xf32, #tpu.memory_space<vmem>>, vector<9x27xf32>
    %c0_7 = arith.constant 0 : index
    %c0_8 = arith.constant 0 : index
    %7 = vector.load %arg5[%c0_7, %c0_8] : memref<1x27xf32, #tpu.memory_space<vmem>>, vector<1x27xf32>
    %c0_9 = arith.constant 0 : index
    %c0_10 = arith.constant 0 : index
    %8 = vector.load %arg1[%c0_9, %c0_10] : memref<2x9xf32, #tpu.memory_space<vmem>>, vector<2x9xf32>
    %cst_11 = arith.constant dense<0.000000e+00> : vector<2x27xf32>
    %9 = tpu.matmul %8, %6, %cst_11 {dimension_numbers = #tpu.dot_dimension_numbers<[1], [0], [0], [1], [0, 0, 1, 1], [], []>, precision = #tpu.contract_precision<fp32>} : vector<2x9xf32>, vector<9x27xf32>, vector<2x27xf32> -> vector<2x27xf32>
    %10 = vector.broadcast %7 : vector<1x27xf32> to vector<2x27xf32>
    %11 = arith.addf %9, %10 : vector<2x27xf32>
    %12 = vector.extract_strided_slice %5 {offsets = [0, 0], sizes = [2, 27], strides = [1, 1]} : vector<16x27xf32> to vector<2x27xf32>
    %13 = vector.extract_strided_slice %12 {offsets = [0, 0], sizes = [2, 9], strides = [1, 1]} : vector<2x27xf32> to vector<2x9xf32>
    %14 = vector.extract_strided_slice %11 {offsets = [0, 0], sizes = [2, 9], strides = [1, 1]} : vector<2x27xf32> to vector<2x9xf32>
    %15 = arith.addf %13, %14 : vector<2x9xf32>
    %16 = arith.negf %15 : vector<2x9xf32>
    %17 = math.exp %16 : vector<2x9xf32>
    %cst_12 = arith.constant 1.000000e+00 : f32
    %18 = vector.broadcast %cst_12 : f32 to vector<2x9xf32>
    %19 = arith.addf %18, %17 : vector<2x9xf32>
    %20 = arith.divf %18, %19 : vector<2x9xf32>
    %21 = vector.extract_strided_slice %12 {offsets = [0, 9], sizes = [2, 9], strides = [1, 1]} : vector<2x27xf32> to vector<2x9xf32>
    %22 = vector.extract_strided_slice %11 {offsets = [0, 9], sizes = [2, 9], strides = [1, 1]} : vector<2x27xf32> to vector<2x9xf32>
    %23 = arith.addf %21, %22 : vector<2x9xf32>
    %24 = arith.negf %23 : vector<2x9xf32>
    %25 = math.exp %24 : vector<2x9xf32>
    %cst_13 = arith.constant 1.000000e+00 : f32
    %26 = vector.broadcast %cst_13 : f32 to vector<2x9xf32>
    %27 = arith.addf %26, %25 : vector<2x9xf32>
    %28 = arith.divf %26, %27 : vector<2x9xf32>
    %29 = vector.extract_strided_slice %12 {offsets = [0, 18], sizes = [2, 9], strides = [1, 1]} : vector<2x27xf32> to vector<2x9xf32>
    %30 = vector.extract_strided_slice %11 {offsets = [0, 18], sizes = [2, 9], strides = [1, 1]} : vector<2x27xf32> to vector<2x9xf32>
    %31 = arith.mulf %20, %30 : vector<2x9xf32>
    %32 = arith.addf %29, %31 : vector<2x9xf32>
    %33 = math.tanh %32 : vector<2x9xf32>
    %cst_14 = arith.constant 1.000000e+00 : f32
    %34 = vector.broadcast %cst_14 : f32 to vector<2x9xf32>
    %35 = arith.subf %34, %28 : vector<2x9xf32>
    %36 = arith.mulf %35, %33 : vector<2x9xf32>
    %37 = arith.mulf %28, %8 : vector<2x9xf32>
    %38 = arith.addf %36, %37 : vector<2x9xf32>
    %c0_15 = arith.constant 0 : index
    %c0_16 = arith.constant 0 : index
    %39 = vector.load %arg12[%c0_15, %c0_16] : memref<16x9xf32, #tpu.memory_space<vmem>>, vector<2x9xf32>
    tpu.vector_store %arg12[%c0_15, %c0_16], %38 {strides = array<i32>} : memref<16x9xf32, #tpu.memory_space<vmem>>, vector<2x9xf32>,
    %cst_17 = arith.constant dense<0.000000e+00> : vector<2x27xf32>
    %40 = tpu.matmul %38, %6, %cst_17 {dimension_numbers = #tpu.dot_dimension_numbers<[1], [0], [0], [1], [0, 0, 1, 1], [], []>, precision = #tpu.contract_precision<fp32>} : vector<2x9xf32>, vector<9x27xf32>, vector<2x27xf32> -> vector<2x27xf32>
    %41 = vector.broadcast %7 : vector<1x27xf32> to vector<2x27xf32>
    %42 = arith.addf %40, %41 : vector<2x27xf32>
    %43 = vector.extract_strided_slice %5 {offsets = [2, 0], sizes = [2, 27], strides = [1, 1]} : vector<16x27xf32> to vector<2x27xf32>
    %44 = vector.extract_strided_slice %43 {offsets = [0, 0], sizes = [2, 9], strides = [1, 1]} : vector<2x27xf32> to vector<2x9xf32>
    %45 = vector.extract_strided_slice %42 {offsets = [0, 0], sizes = [2, 9], strides = [1, 1]} : vector<2x27xf32> to vector<2x9xf32>
    %46 = arith.addf %44, %45 : vector<2x9xf32>
    %47 = arith.negf %46 : vector<2x9xf32>
    %48 = math.exp %47 : vector<2x9xf32>
    %cst_18 = arith.constant 1.000000e+00 : f32
    %49 = vector.broadcast %cst_18 : f32 to vector<2x9xf32>
    %50 = arith.addf %49, %48 : vector<2x9xf32>
    %51 = arith.divf %49, %50 : vector<2x9xf32>
    %52 = vector.extract_strided_slice %43 {offsets = [0, 9], sizes = [2, 9], strides = [1, 1]} : vector<2x27xf32> to vector<2x9xf32>
    %53 = vector.extract_strided_slice %42 {offsets = [0, 9], sizes = [2, 9], strides = [1, 1]} : vector<2x27xf32> to vector<2x9xf32>
    %54 = arith.addf %52, %53 : vector<2x9xf32>
    %55 = arith.negf %54 : vector<2x9xf32>
    %56 = math.exp %55 : vector<2x9xf32>
    %cst_19 = arith.constant 1.000000e+00 : f32
    %57 = vector.broadcast %cst_19 : f32 to vector<2x9xf32>
    %58 = arith.addf %57, %56 : vector<2x9xf32>
    %59 = arith.divf %57, %58 : vector<2x9xf32>
    %60 = vector.extract_strided_slice %43 {offsets = [0, 18], sizes = [2, 9], strides = [1, 1]} : vector<2x27xf32> to vector<2x9xf32>
    %61 = vector.extract_strided_slice %42 {offsets = [0, 18], sizes = [2, 9], strides = [1, 1]} : vector<2x27xf32> to vector<2x9xf32>
    %62 = arith.mulf %51, %61 : vector<2x9xf32>
    %63 = arith.addf %60, %62 : vector<2x9xf32>
    %64 = math.tanh %63 : vector<2x9xf32>
    %cst_20 = arith.constant 1.000000e+00 : f32
    %65 = vector.broadcast %cst_20 : f32 to vector<2x9xf32>
    %66 = arith.subf %65, %59 : vector<2x9xf32>
    %67 = arith.mulf %66, %64 : vector<2x9xf32>
    %68 = arith.mulf %59, %38 : vector<2x9xf32>
    %69 = arith.addf %67, %68 : vector<2x9xf32>
    %c2 = arith.constant 2 : index
    %c0_21 = arith.constant 0 : index
    %70 = vector.load %arg12[%c2, %c0_21] : memref<16x9xf32, #tpu.memory_space<vmem>>, vector<2x9xf32>
    tpu.vector_store %arg12[%c2, %c0_21], %69 {strides = array<i32>} : memref<16x9xf32, #tpu.memory_space<vmem>>, vector<2x9xf32>,
    %cst_22 = arith.constant dense<0.000000e+00> : vector<2x27xf32>
    %71 = tpu.matmul %69, %6, %cst_22 {dimension_numbers = #tpu.dot_dimension_numbers<[1], [0], [0], [1], [0, 0, 1, 1], [], []>, precision = #tpu.contract_precision<fp32>} : vector<2x9xf32>, vector<9x27xf32>, vector<2x27xf32> -> vector<2x27xf32>
    %72 = vector.broadcast %7 : vector<1x27xf32> to vector<2x27xf32>
    %73 = arith.addf %71, %72 : vector<2x27xf32>
    %74 = vector.extract_strided_slice %5 {offsets = [4, 0], sizes = [2, 27], strides = [1, 1]} : vector<16x27xf32> to vector<2x27xf32>
    %75 = vector.extract_strided_slice %74 {offsets = [0, 0], sizes = [2, 9], strides = [1, 1]} : vector<2x27xf32> to vector<2x9xf32>
    %76 = vector.extract_strided_slice %73 {offsets = [0, 0], sizes = [2, 9], strides = [1, 1]} : vector<2x27xf32> to vector<2x9xf32>
    %77 = arith.addf %75, %76 : vector<2x9xf32>
    %78 = arith.negf %77 : vector<2x9xf32>
    %79 = math.exp %78 : vector<2x9xf32>
    %cst_23 = arith.constant 1.000000e+00 : f32
    %80 = vector.broadcast %cst_23 : f32 to vector<2x9xf32>
    %81 = arith.addf %80, %79 : vector<2x9xf32>
    %82 = arith.divf %80, %81 : vector<2x9xf32>
    %83 = vector.extract_strided_slice %74 {offsets = [0, 9], sizes = [2, 9], strides = [1, 1]} : vector<2x27xf32> to vector<2x9xf32>
    %84 = vector.extract_strided_slice %73 {offsets = [0, 9], sizes = [2, 9], strides = [1, 1]} : vector<2x27xf32> to vector<2x9xf32>
    %85 = arith.addf %83, %84 : vector<2x9xf32>
    %86 = arith.negf %85 : vector<2x9xf32>
    %87 = math.exp %86 : vector<2x9xf32>
    %cst_24 = arith.constant 1.000000e+00 : f32
    %88 = vector.broadcast %cst_24 : f32 to vector<2x9xf32>
    %89 = arith.addf %88, %87 : vector<2x9xf32>
    %90 = arith.divf %88, %89 : vector<2x9xf32>
    %91 = vector.extract_strided_slice %74 {offsets = [0, 18], sizes = [2, 9], strides = [1, 1]} : vector<2x27xf32> to vector<2x9xf32>
    %92 = vector.extract_strided_slice %73 {offsets = [0, 18], sizes = [2, 9], strides = [1, 1]} : vector<2x27xf32> to vector<2x9xf32>
    %93 = arith.mulf %82, %92 : vector<2x9xf32>
    %94 = arith.addf %91, %93 : vector<2x9xf32>
    %95 = math.tanh %94 : vector<2x9xf32>
    %cst_25 = arith.constant 1.000000e+00 : f32
    %96 = vector.broadcast %cst_25 : f32 to vector<2x9xf32>
    %97 = arith.subf %96, %90 : vector<2x9xf32>
    %98 = arith.mulf %97, %95 : vector<2x9xf32>
    %99 = arith.mulf %90, %69 : vector<2x9xf32>
    %100 = arith.addf %98, %99 : vector<2x9xf32>
    %c4 = arith.constant 4 : index
    %c0_26 = arith.constant 0 : index
    %101 = vector.load %arg12[%c4, %c0_26] : memref<16x9xf32, #tpu.memory_space<vmem>>, vector<2x9xf32>
    tpu.vector_store %arg12[%c4, %c0_26], %100 {strides = array<i32>} : memref<16x9xf32, #tpu.memory_space<vmem>>, vector<2x9xf32>,
    %cst_27 = arith.constant dense<0.000000e+00> : vector<2x27xf32>
    %102 = tpu.matmul %100, %6, %cst_27 {dimension_numbers = #tpu.dot_dimension_numbers<[1], [0], [0], [1], [0, 0, 1, 1], [], []>, precision = #tpu.contract_precision<fp32>} : vector<2x9xf32>, vector<9x27xf32>, vector<2x27xf32> -> vector<2x27xf32>
    %103 = vector.broadcast %7 : vector<1x27xf32> to vector<2x27xf32>
    %104 = arith.addf %102, %103 : vector<2x27xf32>
    %105 = vector.extract_strided_slice %5 {offsets = [6, 0], sizes = [2, 27], strides = [1, 1]} : vector<16x27xf32> to vector<2x27xf32>
    %106 = vector.extract_strided_slice %105 {offsets = [0, 0], sizes = [2, 9], strides = [1, 1]} : vector<2x27xf32> to vector<2x9xf32>
    %107 = vector.extract_strided_slice %104 {offsets = [0, 0], sizes = [2, 9], strides = [1, 1]} : vector<2x27xf32> to vector<2x9xf32>
    %108 = arith.addf %106, %107 : vector<2x9xf32>
    %109 = arith.negf %108 : vector<2x9xf32>
    %110 = math.exp %109 : vector<2x9xf32>
    %cst_28 = arith.constant 1.000000e+00 : f32
    %111 = vector.broadcast %cst_28 : f32 to vector<2x9xf32>
    %112 = arith.addf %111, %110 : vector<2x9xf32>
    %113 = arith.divf %111, %112 : vector<2x9xf32>
    %114 = vector.extract_strided_slice %105 {offsets = [0, 9], sizes = [2, 9], strides = [1, 1]} : vector<2x27xf32> to vector<2x9xf32>
    %115 = vector.extract_strided_slice %104 {offsets = [0, 9], sizes = [2, 9], strides = [1, 1]} : vector<2x27xf32> to vector<2x9xf32>
    %116 = arith.addf %114, %115 : vector<2x9xf32>
    %117 = arith.negf %116 : vector<2x9xf32>
    %118 = math.exp %117 : vector<2x9xf32>
    %cst_29 = arith.constant 1.000000e+00 : f32
    %119 = vector.broadcast %cst_29 : f32 to vector<2x9xf32>
    %120 = arith.addf %119, %118 : vector<2x9xf32>
    %121 = arith.divf %119, %120 : vector<2x9xf32>
    %122 = vector.extract_strided_slice %105 {offsets = [0, 18], sizes = [2, 9], strides = [1, 1]} : vector<2x27xf32> to vector<2x9xf32>
    %123 = vector.extract_strided_slice %104 {offsets = [0, 18], sizes = [2, 9], strides = [1, 1]} : vector<2x27xf32> to vector<2x9xf32>
    %124 = arith.mulf %113, %123 : vector<2x9xf32>
    %125 = arith.addf %122, %124 : vector<2x9xf32>
    %126 = math.tanh %125 : vector<2x9xf32>
    %cst_30 = arith.constant 1.000000e+00 : f32
    %127 = vector.broadcast %cst_30 : f32 to vector<2x9xf32>
    %128 = arith.subf %127, %121 : vector<2x9xf32>
    %129 = arith.mulf %128, %126 : vector<2x9xf32>
    %130 = arith.mulf %121, %100 : vector<2x9xf32>
    %131 = arith.addf %129, %130 : vector<2x9xf32>
    %c6 = arith.constant 6 : index
    %c0_31 = arith.constant 0 : index
    %132 = vector.load %arg12[%c6, %c0_31] : memref<16x9xf32, #tpu.memory_space<vmem>>, vector<2x9xf32>
    tpu.vector_store %arg12[%c6, %c0_31], %131 {strides = array<i32>} : memref<16x9xf32, #tpu.memory_space<vmem>>, vector<2x9xf32>,
    %cst_32 = arith.constant dense<0.000000e+00> : vector<2x27xf32>
    %133 = tpu.matmul %131, %6, %cst_32 {dimension_numbers = #tpu.dot_dimension_numbers<[1], [0], [0], [1], [0, 0, 1, 1], [], []>, precision = #tpu.contract_precision<fp32>} : vector<2x9xf32>, vector<9x27xf32>, vector<2x27xf32> -> vector<2x27xf32>
    %134 = vector.broadcast %7 : vector<1x27xf32> to vector<2x27xf32>
    %135 = arith.addf %133, %134 : vector<2x27xf32>
    %136 = vector.extract_strided_slice %5 {offsets = [8, 0], sizes = [2, 27], strides = [1, 1]} : vector<16x27xf32> to vector<2x27xf32>
    %137 = vector.extract_strided_slice %136 {offsets = [0, 0], sizes = [2, 9], strides = [1, 1]} : vector<2x27xf32> to vector<2x9xf32>
    %138 = vector.extract_strided_slice %135 {offsets = [0, 0], sizes = [2, 9], strides = [1, 1]} : vector<2x27xf32> to vector<2x9xf32>
    %139 = arith.addf %137, %138 : vector<2x9xf32>
    %140 = arith.negf %139 : vector<2x9xf32>
    %141 = math.exp %140 : vector<2x9xf32>
    %cst_33 = arith.constant 1.000000e+00 : f32
    %142 = vector.broadcast %cst_33 : f32 to vector<2x9xf32>
    %143 = arith.addf %142, %141 : vector<2x9xf32>
    %144 = arith.divf %142, %143 : vector<2x9xf32>
    %145 = vector.extract_strided_slice %136 {offsets = [0, 9], sizes = [2, 9], strides = [1, 1]} : vector<2x27xf32> to vector<2x9xf32>
    %146 = vector.extract_strided_slice %135 {offsets = [0, 9], sizes = [2, 9], strides = [1, 1]} : vector<2x27xf32> to vector<2x9xf32>
    %147 = arith.addf %145, %146 : vector<2x9xf32>
    %148 = arith.negf %147 : vector<2x9xf32>
    %149 = math.exp %148 : vector<2x9xf32>
    %cst_34 = arith.constant 1.000000e+00 : f32
    %150 = vector.broadcast %cst_34 : f32 to vector<2x9xf32>
    %151 = arith.addf %150, %149 : vector<2x9xf32>
    %152 = arith.divf %150, %151 : vector<2x9xf32>
    %153 = vector.extract_strided_slice %136 {offsets = [0, 18], sizes = [2, 9], strides = [1, 1]} : vector<2x27xf32> to vector<2x9xf32>
    %154 = vector.extract_strided_slice %135 {offsets = [0, 18], sizes = [2, 9], strides = [1, 1]} : vector<2x27xf32> to vector<2x9xf32>
    %155 = arith.mulf %144, %154 : vector<2x9xf32>
    %156 = arith.addf %153, %155 : vector<2x9xf32>
    %157 = math.tanh %156 : vector<2x9xf32>
    %cst_35 = arith.constant 1.000000e+00 : f32
    %158 = vector.broadcast %cst_35 : f32 to vector<2x9xf32>
    %159 = arith.subf %158, %152 : vector<2x9xf32>
    %160 = arith.mulf %159, %157 : vector<2x9xf32>
    %161 = arith.mulf %152, %131 : vector<2x9xf32>
    %162 = arith.addf %160, %161 : vector<2x9xf32>
    %c8 = arith.constant 8 : index
    %c0_36 = arith.constant 0 : index
    %163 = vector.load %arg12[%c8, %c0_36] : memref<16x9xf32, #tpu.memory_space<vmem>>, vector<2x9xf32>
    tpu.vector_store %arg12[%c8, %c0_36], %162 {strides = array<i32>} : memref<16x9xf32, #tpu.memory_space<vmem>>, vector<2x9xf32>,
    %cst_37 = arith.constant dense<0.000000e+00> : vector<2x27xf32>
    %164 = tpu.matmul %162, %6, %cst_37 {dimension_numbers = #tpu.dot_dimension_numbers<[1], [0], [0], [1], [0, 0, 1, 1], [], []>, precision = #tpu.contract_precision<fp32>} : vector<2x9xf32>, vector<9x27xf32>, vector<2x27xf32> -> vector<2x27xf32>
    %165 = vector.broadcast %7 : vector<1x27xf32> to vector<2x27xf32>
    %166 = arith.addf %164, %165 : vector<2x27xf32>
    %167 = vector.extract_strided_slice %5 {offsets = [10, 0], sizes = [2, 27], strides = [1, 1]} : vector<16x27xf32> to vector<2x27xf32>
    %168 = vector.extract_strided_slice %167 {offsets = [0, 0], sizes = [2, 9], strides = [1, 1]} : vector<2x27xf32> to vector<2x9xf32>
    %169 = vector.extract_strided_slice %166 {offsets = [0, 0], sizes = [2, 9], strides = [1, 1]} : vector<2x27xf32> to vector<2x9xf32>
    %170 = arith.addf %168, %169 : vector<2x9xf32>
    %171 = arith.negf %170 : vector<2x9xf32>
    %172 = math.exp %171 : vector<2x9xf32>
    %cst_38 = arith.constant 1.000000e+00 : f32
    %173 = vector.broadcast %cst_38 : f32 to vector<2x9xf32>
    %174 = arith.addf %173, %172 : vector<2x9xf32>
    %175 = arith.divf %173, %174 : vector<2x9xf32>
    %176 = vector.extract_strided_slice %167 {offsets = [0, 9], sizes = [2, 9], strides = [1, 1]} : vector<2x27xf32> to vector<2x9xf32>
    %177 = vector.extract_strided_slice %166 {offsets = [0, 9], sizes = [2, 9], strides = [1, 1]} : vector<2x27xf32> to vector<2x9xf32>
    %178 = arith.addf %176, %177 : vector<2x9xf32>
    %179 = arith.negf %178 : vector<2x9xf32>
    %180 = math.exp %179 : vector<2x9xf32>
    %cst_39 = arith.constant 1.000000e+00 : f32
    %181 = vector.broadcast %cst_39 : f32 to vector<2x9xf32>
    %182 = arith.addf %181, %180 : vector<2x9xf32>
    %183 = arith.divf %181, %182 : vector<2x9xf32>
    %184 = vector.extract_strided_slice %167 {offsets = [0, 18], sizes = [2, 9], strides = [1, 1]} : vector<2x27xf32> to vector<2x9xf32>
    %185 = vector.extract_strided_slice %166 {offsets = [0, 18], sizes = [2, 9], strides = [1, 1]} : vector<2x27xf32> to vector<2x9xf32>
    %186 = arith.mulf %175, %185 : vector<2x9xf32>
    %187 = arith.addf %184, %186 : vector<2x9xf32>
    %188 = math.tanh %187 : vector<2x9xf32>
    %cst_40 = arith.constant 1.000000e+00 : f32
    %189 = vector.broadcast %cst_40 : f32 to vector<2x9xf32>
    %190 = arith.subf %189, %183 : vector<2x9xf32>
    %191 = arith.mulf %190, %188 : vector<2x9xf32>
    %192 = arith.mulf %183, %162 : vector<2x9xf32>
    %193 = arith.addf %191, %192 : vector<2x9xf32>
    %c10 = arith.constant 10 : index
    %c0_41 = arith.constant 0 : index
    %194 = vector.load %arg12[%c10, %c0_41] : memref<16x9xf32, #tpu.memory_space<vmem>>, vector<2x9xf32>
    tpu.vector_store %arg12[%c10, %c0_41], %193 {strides = array<i32>} : memref<16x9xf32, #tpu.memory_space<vmem>>, vector<2x9xf32>,
    %cst_42 = arith.constant dense<0.000000e+00> : vector<2x27xf32>
    %195 = tpu.matmul %193, %6, %cst_42 {dimension_numbers = #tpu.dot_dimension_numbers<[1], [0], [0], [1], [0, 0, 1, 1], [], []>, precision = #tpu.contract_precision<fp32>} : vector<2x9xf32>, vector<9x27xf32>, vector<2x27xf32> -> vector<2x27xf32>
    %196 = vector.broadcast %7 : vector<1x27xf32> to vector<2x27xf32>
    %197 = arith.addf %195, %196 : vector<2x27xf32>
    %198 = vector.extract_strided_slice %5 {offsets = [12, 0], sizes = [2, 27], strides = [1, 1]} : vector<16x27xf32> to vector<2x27xf32>
    %199 = vector.extract_strided_slice %198 {offsets = [0, 0], sizes = [2, 9], strides = [1, 1]} : vector<2x27xf32> to vector<2x9xf32>
    %200 = vector.extract_strided_slice %197 {offsets = [0, 0], sizes = [2, 9], strides = [1, 1]} : vector<2x27xf32> to vector<2x9xf32>
    %201 = arith.addf %199, %200 : vector<2x9xf32>
    %202 = arith.negf %201 : vector<2x9xf32>
    %203 = math.exp %202 : vector<2x9xf32>
    %cst_43 = arith.constant 1.000000e+00 : f32
    %204 = vector.broadcast %cst_43 : f32 to vector<2x9xf32>
    %205 = arith.addf %204, %203 : vector<2x9xf32>
    %206 = arith.divf %204, %205 : vector<2x9xf32>
    %207 = vector.extract_strided_slice %198 {offsets = [0, 9], sizes = [2, 9], strides = [1, 1]} : vector<2x27xf32> to vector<2x9xf32>
    %208 = vector.extract_strided_slice %197 {offsets = [0, 9], sizes = [2, 9], strides = [1, 1]} : vector<2x27xf32> to vector<2x9xf32>
    %209 = arith.addf %207, %208 : vector<2x9xf32>
    %210 = arith.negf %209 : vector<2x9xf32>
    %211 = math.exp %210 : vector<2x9xf32>
    %cst_44 = arith.constant 1.000000e+00 : f32
    %212 = vector.broadcast %cst_44 : f32 to vector<2x9xf32>
    %213 = arith.addf %212, %211 : vector<2x9xf32>
    %214 = arith.divf %212, %213 : vector<2x9xf32>
    %215 = vector.extract_strided_slice %198 {offsets = [0, 18], sizes = [2, 9], strides = [1, 1]} : vector<2x27xf32> to vector<2x9xf32>
    %216 = vector.extract_strided_slice %197 {offsets = [0, 18], sizes = [2, 9], strides = [1, 1]} : vector<2x27xf32> to vector<2x9xf32>
    %217 = arith.mulf %206, %216 : vector<2x9xf32>
    %218 = arith.addf %215, %217 : vector<2x9xf32>
    %219 = math.tanh %218 : vector<2x9xf32>
    %cst_45 = arith.constant 1.000000e+00 : f32
    %220 = vector.broadcast %cst_45 : f32 to vector<2x9xf32>
    %221 = arith.subf %220, %214 : vector<2x9xf32>
    %222 = arith.mulf %221, %219 : vector<2x9xf32>
    %223 = arith.mulf %214, %193 : vector<2x9xf32>
    %224 = arith.addf %222, %223 : vector<2x9xf32>
    %c12 = arith.constant 12 : index
    %c0_46 = arith.constant 0 : index
    %225 = vector.load %arg12[%c12, %c0_46] : memref<16x9xf32, #tpu.memory_space<vmem>>, vector<2x9xf32>
    tpu.vector_store %arg12[%c12, %c0_46], %224 {strides = array<i32>} : memref<16x9xf32, #tpu.memory_space<vmem>>, vector<2x9xf32>,
    %cst_47 = arith.constant dense<0.000000e+00> : vector<2x27xf32>
    %226 = tpu.matmul %224, %6, %cst_47 {dimension_numbers = #tpu.dot_dimension_numbers<[1], [0], [0], [1], [0, 0, 1, 1], [], []>, precision = #tpu.contract_precision<fp32>} : vector<2x9xf32>, vector<9x27xf32>, vector<2x27xf32> -> vector<2x27xf32>
    %227 = vector.broadcast %7 : vector<1x27xf32> to vector<2x27xf32>
    %228 = arith.addf %226, %227 : vector<2x27xf32>
    %229 = vector.extract_strided_slice %5 {offsets = [14, 0], sizes = [2, 27], strides = [1, 1]} : vector<16x27xf32> to vector<2x27xf32>
    %230 = vector.extract_strided_slice %229 {offsets = [0, 0], sizes = [2, 9], strides = [1, 1]} : vector<2x27xf32> to vector<2x9xf32>
    %231 = vector.extract_strided_slice %228 {offsets = [0, 0], sizes = [2, 9], strides = [1, 1]} : vector<2x27xf32> to vector<2x9xf32>
    %232 = arith.addf %230, %231 : vector<2x9xf32>
    %233 = arith.negf %232 : vector<2x9xf32>
    %234 = math.exp %233 : vector<2x9xf32>
    %cst_48 = arith.constant 1.000000e+00 : f32
    %235 = vector.broadcast %cst_48 : f32 to vector<2x9xf32>
    %236 = arith.addf %235, %234 : vector<2x9xf32>
    %237 = arith.divf %235, %236 : vector<2x9xf32>
    %238 = vector.extract_strided_slice %229 {offsets = [0, 9], sizes = [2, 9], strides = [1, 1]} : vector<2x27xf32> to vector<2x9xf32>
    %239 = vector.extract_strided_slice %228 {offsets = [0, 9], sizes = [2, 9], strides = [1, 1]} : vector<2x27xf32> to vector<2x9xf32>
    %240 = arith.addf %238, %239 : vector<2x9xf32>
    %241 = arith.negf %240 : vector<2x9xf32>
    %242 = math.exp %241 : vector<2x9xf32>
    %cst_49 = arith.constant 1.000000e+00 : f32
    %243 = vector.broadcast %cst_49 : f32 to vector<2x9xf32>
    %244 = arith.addf %243, %242 : vector<2x9xf32>
    %245 = arith.divf %243, %244 : vector<2x9xf32>
    %246 = vector.extract_strided_slice %229 {offsets = [0, 18], sizes = [2, 9], strides = [1, 1]} : vector<2x27xf32> to vector<2x9xf32>
    %247 = vector.extract_strided_slice %228 {offsets = [0, 18], sizes = [2, 9], strides = [1, 1]} : vector<2x27xf32> to vector<2x9xf32>
    %248 = arith.mulf %237, %247 : vector<2x9xf32>
    %249 = arith.addf %246, %248 : vector<2x9xf32>
    %250 = math.tanh %249 : vector<2x9xf32>
    %cst_50 = arith.constant 1.000000e+00 : f32
    %251 = vector.broadcast %cst_50 : f32 to vector<2x9xf32>
    %252 = arith.subf %251, %245 : vector<2x9xf32>
    %253 = arith.mulf %252, %250 : vector<2x9xf32>
    %254 = arith.mulf %245, %224 : vector<2x9xf32>
    %255 = arith.addf %253, %254 : vector<2x9xf32>
    %c14 = arith.constant 14 : index
    %c0_51 = arith.constant 0 : index
    %256 = vector.load %arg12[%c14, %c0_51] : memref<16x9xf32, #tpu.memory_space<vmem>>, vector<2x9xf32>
    tpu.vector_store %arg12[%c14, %c0_51], %255 {strides = array<i32>} : memref<16x9xf32, #tpu.memory_space<vmem>>, vector<2x9xf32>,
    %c0_52 = arith.constant 0 : index
    %c0_53 = arith.constant 0 : index
    %257 = vector.load %arg11[%c0_52, %c0_53] : memref<2x9xf32, #tpu.memory_space<vmem>>, vector<2x9xf32>
    tpu.vector_store %arg11[%c0_52, %c0_53], %255 {strides = array<i32>} : memref<2x9xf32, #tpu.memory_space<vmem>>, vector<2x9xf32>,
    %c0_54 = arith.constant 0 : index
    %c0_55 = arith.constant 0 : index
    %258 = vector.load %arg12[%c0_54, %c0_55] : memref<16x9xf32, #tpu.memory_space<vmem>>, vector<16x9xf32>
    %c0_56 = arith.constant 0 : index
    %c0_57 = arith.constant 0 : index
    %259 = vector.load %arg6[%c0_56, %c0_57] : memref<9x14xf32, #tpu.memory_space<vmem>>, vector<9x14xf32>
    %cst_58 = arith.constant dense<0.000000e+00> : vector<16x14xf32>
    %260 = tpu.matmul %258, %259, %cst_58 {dimension_numbers = #tpu.dot_dimension_numbers<[1], [0], [0], [1], [0, 0, 1, 1], [], []>, precision = #tpu.contract_precision<fp32>} : vector<16x9xf32>, vector<9x14xf32>, vector<16x14xf32> -> vector<16x14xf32>
    %c0_59 = arith.constant 0 : index
    %c0_60 = arith.constant 0 : index
    %261 = vector.load %arg7[%c0_59, %c0_60] : memref<1x14xf32, #tpu.memory_space<vmem>>, vector<1x14xf32>
    %262 = vector.broadcast %261 : vector<1x14xf32> to vector<16x14xf32>
    %263 = arith.addf %260, %262 : vector<16x14xf32>
    %cst_61 = arith.constant 0.000000e+00 : f32
    %264 = vector.broadcast %cst_61 : f32 to vector<16x14xf32>
    %265 = arith.cmpf oge, %263, %264 : vector<16x14xf32>
    %cst_62 = arith.constant 0.00999999977 : f32
    %266 = vector.broadcast %cst_62 : f32 to vector<16x14xf32>
    %267 = arith.mulf %266, %263 : vector<16x14xf32>
    %268 = arith.select %265, %263, %267 : vector<16x14xi1>, vector<16x14xf32>
    %c0_63 = arith.constant 0 : index
    %c0_64 = arith.constant 0 : index
    %269 = vector.load %arg8[%c0_63, %c0_64] : memref<14x128xf32, #tpu.memory_space<vmem>>, vector<14x128xf32>
    %cst_65 = arith.constant dense<0.000000e+00> : vector<16x128xf32>
    %270 = tpu.matmul %268, %269, %cst_65 {dimension_numbers = #tpu.dot_dimension_numbers<[1], [0], [0], [1], [0, 0, 1, 1], [], []>, precision = #tpu.contract_precision<fp32>} : vector<16x14xf32>, vector<14x128xf32>, vector<16x128xf32> -> vector<16x128xf32>
    %c0_66 = arith.constant 0 : index
    %c0_67 = arith.constant 0 : index
    %271 = vector.load %arg9[%c0_66, %c0_67] : memref<1x128xf32, #tpu.memory_space<vmem>>, vector<1x128xf32>
    %272 = vector.broadcast %271 : vector<1x128xf32> to vector<16x128xf32>
    %273 = arith.addf %270, %272 : vector<16x128xf32>
    %c0_68 = arith.constant 0 : index
    %c0_69 = arith.constant 0 : index
    %274 = vector.load %arg10[%c0_68, %c0_69] : memref<16x128xf32, #tpu.memory_space<vmem>>, vector<16x128xf32>
    tpu.vector_store %arg10[%c0_68, %c0_69], %273 {strides = array<i32>} : memref<16x128xf32, #tpu.memory_space<vmem>>, vector<16x128xf32>,
    return
  }
}

</mosaic_0001>

<bundles_post_ra>
// kernel: tpu_custom_call.1
= control target key start
LH: loop header
LB: loop body
LE: loop exit
PB: predicated region body
PF: predicated region fallthrough
CT: control target
= control target key end

     0   :  { %17 = vsyncpa [#allocation4], 0  ;;  %s7166_s0 = inlined_call_operand.vmem [shape: f32[16,5], index: 0, kind: input, shape index: {}]   ;;  %s7167_s1 = inlined_call_operand.hbm [shape: f32[2,9], index: 1, kind: input, shape index: {}]   ;;  %s7168_s2 = inlined_call_operand.hbm [shape: f32[5,27], index: 2, kind: input, shape index: {}]   ;;  %s7169_s3 = inlined_call_operand.vmem [shape: f32[1,27], index: 3, kind: input, shape index: {}]   ;;  %s7170_s4 = inlined_call_operand.vmem [shape: f32[9,27], index: 4, kind: input, shape index: {}]   ;;  %s7171_s5 = inlined_call_operand.hbm [shape: f32[1,27], index: 5, kind: input, shape index: {}]   ;;  %s7172_s6 = inlined_call_operand.vmem [shape: f32[9,14], index: 6, kind: input, shape index: {}]   ;;  %s7173_s7 = inlined_call_operand.vmem [shape: f32[1,14], index: 7, kind: input, shape index: {}]   ;;  %s7174_s8 = inlined_call_operand.hbm [shape: f32[14,128], index: 8, kind: input, shape index: {}]   ;;  %s7175_s9 = inlined_call_operand.vmem [shape: f32[1,128], index: 9, kind: input, shape index: {}]   ;;  %s7176_s10 = inlined_call_operand.hbm [shape: f32[16,128], index: 10, kind: output, shape index: {0}]   ;;  %s7177_s11 = inlined_call_operand.hbm [shape: f32[2,9], index: 11, kind: output, shape index: {1}]  }
   0x1   :  { %18 = vsyncpa [#allocation7], 0 }
   0x2   :  { %19 = vsyncpa [#allocation10], 0 }
   0x3   :  { %20 = vsyncpa [#allocation5], 0 }
   0x4   :  { %21 = vsyncpa [#allocation13], 0  ;;  %s6548_s17 = smov [#allocation6]   ;;  %s6549_s19 = smov [#allocation3]  }
   0x5   :  { %s40_s18 = sshll.u32 %s6548_s17, 4  ;;  %s30_s20 = sshll.u32 %s6549_s19, 4  ;;  %s41_s18 = int_to_ptr.vmem [resolvable:$true] %s40_s18  ;;  %s31_s20 = int_to_ptr.vmem [resolvable:$true] %s30_s20 }
   0x6   :  { %s6426_s21 = scalar_lea.vmem %s41_s18, 128  ;;  %p6431_p1 = scmp.lt.s32.totalorder %s41_s18, %s41_s18 }
   0x7   :  { %p6427_p0 = scmp.ne.s32.totalorder %s41_s18, %s6426_s21  ;;  %p6432_p2 = scmp.lt.s32.totalorder %s6426_s21, %s6426_s21 }
   0x9   :  { %p6433_p3 = por %p6432_p2, %p6431_p1 }
   0xb   :  { %p6434_p4 = pnand %p6433_p3, %p6427_p0 }
   0xd   :  { %6437 = shalt.err (!%p6434_p4)
}
   0xe   :  { %43 = dma.hbm_to_vmem [thread:$0]  %s7168_s2, 128, %s41_s18, [#allocation7]  }
   0xf   :  { %s6446_s24 = scalar_lea.vmem %s31_s20, 32  ;;  %p6451_p6 = scmp.lt.s32.totalorder %s31_s20, %s31_s20 }
  0x10   :  { %p6447_p5 = scmp.ne.s32.totalorder %s31_s20, %s6446_s24  ;;  %p6452_p7 = scmp.lt.s32.totalorder %s6446_s24, %s6446_s24 }
  0x12   :  { %p6453_p8 = por %p6452_p7, %p6451_p6 }
  0x14   :  { %p6454_p9 = pnand %p6453_p8, %p6447_p5 }
  0x16   :  { %6457 = shalt.err (!%p6454_p9)
}
  0x17   :  { %33 = dma.hbm_to_vmem [thread:$0]  %s7167_s1, 32, %s31_s20, [#allocation4]  }
  0x18   :  { %s6550_s27 = smov [#allocation8]   ;;  %s6551_s29 = smov [#allocation9]  }
  0x19   :  { %s54_s28 = sshll.u32 %s6550_s27, 4  ;;  %s67_s30 = sshll.u32 %s6551_s29, 4  ;;  %s55_s28 = int_to_ptr.vmem [resolvable:$true] %s54_s28  ;;  %s68_s30 = int_to_ptr.vmem [resolvable:$true] %s67_s30 }
  0x1a   :  { %s6466_s12 = scalar_lea.vmem %s55_s28, 16  ;;  %s6470_s2 = scalar_lea.vmem %s55_s28, 32 }
  0x1b   :  { %p6467_p10 = scmp.ne.s32.totalorder %s55_s28, %s6466_s12  ;;  %p6471_p11 = scmp.lt.s32.totalorder %s55_s28, %s55_s28 }
  0x1c   :  { %p6472_p12 = scmp.lt.s32.totalorder %s6470_s2, %s6466_s12 }
  0x1e   :  { %p6473_p13 = por %p6472_p12, %p6471_p11 }
  0x20   :  { %p6474_p0 = pnand %p6473_p13, %p6467_p10 }
  0x22   :  { %6477 = shalt.err (!%p6474_p0)
}
  0x23   :  { %57 = dma.hbm_to_vmem [thread:$0]  %s7171_s5, 16, %s55_s28, [#allocation7]  }
  0x24   :  { %s6486_s15 = scalar_lea.vmem %s68_s30, 256  ;;  %p6491_p2 = scmp.lt.s32.totalorder %s68_s30, %s68_s30 }
  0x25   :  { %p6487_p1 = scmp.ne.s32.totalorder %s68_s30, %s6486_s15  ;;  %p6492_p3 = scmp.lt.s32.totalorder %s6486_s15, %s6486_s15 }
  0x27   :  { %p6493_p4 = por %p6492_p3, %p6491_p2 }
  0x29   :  { %p6494_p5 = pnand %p6493_p4, %p6487_p1 }
  0x2b   :  { %6497 = shalt.err (!%p6494_p5)
}
  0x2c   :  { %s6552_s1 = smov 128   ;;  %s6553_s16 = smov 8  }
  0x2d   :  { %73 = dma.hbm_to_vmem [thread:$0]  %s7174_s8, 256, %s68_s30, [#allocation10], %s6552_s1, %s6552_s1, %s6553_s16  }
  0x2e   :  { %6538 = dma.done.wait [#allocation4], 32  }
  0x2f   :  { %6539 = vsyncadd [#allocation4], 4294967264 }
  0x30   :  { %6540 = dma.done.wait [#allocation7], 144  }
  0x31   :  { %6541 = vsyncadd [#allocation7], 4294967152 }
  0x32   :  { %6542 = dma.done.wait [#allocation10], 256  }
  0x33   :  { %6543 = vsyncadd [#allocation10], 4294967040  ;;  %vm105_vm0 = vcmask 1044480   ;;  %vm98_vm1 = vcmask 39936   ;;  %vm612_vm2 = vcmask 1040384   ;;  %v88_v1 = vld [vmem:[%s7166_s0] sm:$0xff] }
  0x34   :  { %v90_v0 = vld [vmem:[#allocation6] sm:$0x1f]  ;;  %v89_v2 = vld [vmem:[%s7166_s0 + $0x8] sm:$0xff]  ;;  %vm608_vm3 = vcmask 72704   ;;  %v100_v4 = vsel %vm98_vm1, %v88_v1, 0  ;;  %v598_v17 = vld [vmem:[%s7170_s4] sm:$0xff] }
  0x35   :  { %v107_v3 = vsel %vm105_vm0, %v90_v0, 0  ;;  %v103_v5 = vsel %vm98_vm1, %v89_v2, 0  ;;  %v599_v6 = vld [vmem:[%s7170_s4 + $0x8] sm:$0x1]  ;;  %v175_v8 = vand.u32 4294901760, %v100_v4  ;;  %v6658_v22 = vand.u32 4294901760, %v598_v17 }
  0x36   :  { %v140_v7 = vand.u32 4294901760, %v107_v3  ;;  %v185_v9 = vand.u32 4294901760, %v103_v5  ;;  %v614_v10 = vsel %vm612_vm2, %v599_v6, 0  ;;  %v6647_v11 = vld [vmem:[#allocation3] sm:$0x3]  ;;  %v6554_v38 = vmov 0.0  }
  0x37   :  { %v610_v12 = vsel %vm608_vm3, %v6647_v11, 0  ;;  %v176_v13 = vsub.f32 %v100_v4, %v175_v8  ;;  %5912 = vmatprep.mubr.f32.mxu1 %v175_v8  ;;  %v6651_v16 = vand.u32 4294901760, %v614_v10  ;;  %v6665_v31 = vsub.f32 %v598_v17, %v6658_v22  ;;  %v5683_v42 = vld [vmem:[%s7169_s3] ss:$0 sm:$0xff]  ;;  %v6739_v2 = vld [vmem:[#allocation8] ss:$0 sm:$0xff] }
  0x38   :  { %5905 = vmatprep.subr.mxu0 %v140_v7  ;;  %v227_v14 = vsub.f32 %v107_v3, %v140_v7  ;;  %v186_v15 = vsub.f32 %v103_v5, %v185_v9  ;;  %v6656_v21 = vand.u32 4294901760, %v610_v12  ;;  %vm6555_vm4 = vmmov 0   ;;  %s6556_s3 = smov 110   ;;  %s6557_s25 = smov 18  }
  0x39   :  { %5906 = vmatpush3.msra.mxu0 %v140_v7  ;;  %v177_v18 = vand.u32 4294901760, %v176_v13  ;;  %v6661_v26 = vsub.f32 %v614_v10, %v6651_v16  ;;  %v6671_v34 = vand.u32 4294901760, %v6665_v31  ;;  %s6558_s26 = smov 119   ;;  %s6559_s27 = smov 9   ;;  %vm1108_vm5 = vcmask 66560  }
  0x3a   :  { %v228_v19 = vand.u32 4294901760, %v227_v14  ;;  %5915 = vmatprep.subr.mxu0 %v227_v14  ;;  %v187_v20 = vand.u32 4294901760, %v186_v15  ;;  %v684_v30 = vsub.f32 %v610_v12, %v6656_v21  ;;  %vm1605_vm6 = vcmask 68610  }
  0x3b   :  { %v178_v23 = vsub.f32 %v176_v13, %v177_v18  ;;  %v6668_v32 = vand.u32 4294901760, %v6661_v26  ;;  %v732_v37 = vsub.f32 %v6665_v31, %v6671_v34  ;;  %vm2605_vm7 = vcmask 72710  }
  0x3c   :  { %v229_v24 = vsub.f32 %v227_v14, %v228_v19  ;;  %v188_v25 = vsub.f32 %v186_v15, %v187_v20  ;;  %v685_v33 = vand.u32 4294901760, %v684_v30  ;;  %vm2105_vm8 = vcmask 70660  }
  0x3d   :  { %v179_v27 = vand.u32 4294901760, %v178_v23  ;;  %v725_v35 = vsub.f32 %v6661_v26, %v6668_v32  ;;  %v6683_v41 = vand.u32 4294901760, %v732_v37  ;;  %vm5142_vm9 = vcmask 1045504  }
  0x3e   :  { %v230_v28 = vand.u32 4294901760, %v229_v24  ;;  %v189_v29 = vand.u32 4294901760, %v188_v25  ;;  %v686_v36 = vsub.f32 %v684_v30, %v685_v33  ;;  %vm5135_vm11 = vcmask 113664  }
  0x3f   :  { %5907 = vmatprep.mubr.f32.mxu0 %v179_v27  ;;  %v6678_v39 = vand.u32 4294901760, %v725_v35 }
  0x40   :  { %5910 = vmatprep.subr.mxu1 %v230_v28  ;;  %5908 = vmatmul.mubr.f32.vlgmr.msra.gmra.mxu0 %v189_v29  ;;  %v687_v40 = vand.u32 4294901760, %v686_v36 }
  0x41   :  { %5911 = vmatpush3.msra.mxu1 %v230_v28  ;;  %5916 = vmatpush3.msra.mxu0 %v227_v14 }
  0x42   :  { %5913 = vmatmul.mubr.f32.vlgmr.msra.gmra.mxu1 %v185_v9  ;;  %5920 = vmatprep.subr.mxu1 %v140_v7 }
  0x43   :  { %5917 = vmatprep.mubr.f32.mxu0 %v176_v13  ;;  %5921 = vmatpush3.msra.mxu1 %v140_v7 }
  0x44   :  { %5925 = vmatprep.subr.mxu0 %v228_v19  ;;  %5918 = vmatmul.mubr.f32.vlgmr.msra.gmra.mxu0 %v186_v15 }
  0x45   :  { %5922 = vmatprep.mubr.f32.mxu1 %v177_v18  ;;  %5926 = vmatpush3.msra.mxu0 %v228_v19 }
  0x46   :  { %5923 = vmatmul.mubr.f32.vlgmr.msra.gmra.mxu1 %v187_v20  ;;  %5930 = vmatprep.subr.mxu1 %v140_v7 }
  0x47   :  { %5927 = vmatprep.mubr.f32.mxu0 %v175_v8  ;;  %5931 = vmatpush3.msra.mxu1 %v140_v7 }
  0x48   :  { %5935 = vmatprep.subr.mxu0 %v6554_v38  ;;  %5928 = vmatmul.mubr.f32.vlgmr.msra.gmra.mxu0 %v185_v9 }
  0x49   :  { %5932 = vmatprep.mubr.f32.mxu1 %v175_v8  ;;  %5936 = vmatpush3.msra.mxu0 %v6651_v16 }
  0x4a   :  { %5933 = vmatmul.mubr.f32.vlgmr.msra.gmra.mxu1 %v185_v9  ;;  %5937 = vmatprep.subr.mxu0 %v6554_v38 }
  0x4b   :  { %5942 = vmatprep.subr.mxu1 %v6554_v38  ;;  %5938 = vmatpush3.msra.mxu0 %v6658_v22 }
  0x4c   :  { %5943 = vmatpush3.msra.mxu1 %v6678_v39  ;;  %5939 = vmatprep.mubr.msk.f32.mxu0 %vm6555_vm4, %v6554_v38 }
  0x4d   :  { %5944 = vmatprep.subr.mxu1 %v6554_v38  ;;  %5949 = vmatprep.subr.mxu0 %v6554_v38 }
  0x4e   :  { %5940 = vmatmul.mubr.f32.vlgmr.msra.gmra.mxu0 %v687_v40  ;;  %5945 = vmatpush3.msra.mxu1 %v6683_v41 }
  0x4f   :  { %5946 = vmatprep.mubr.msk.f32.mxu1 %vm6555_vm4, %v6554_v38  ;;  %5950 = vmatpush3.msra.mxu0 %v6661_v26 }
  0x50   :  { %5947 = vmatmul.mubr.f32.vlgmr.msra.gmra.mxu1 %v6656_v21  ;;  %5951 = vmatprep.subr.mxu0 %v6554_v38 }
  0x51   :  { %5956 = vmatprep.subr.mxu1 %v6554_v38  ;;  %5952 = vmatpush3.msra.mxu0 %v6665_v31 }
  0x52   :  { %5957 = vmatpush3.msra.mxu1 %v6651_v16  ;;  %5953 = vmatprep.mubr.msk.f32.mxu0 %vm6555_vm4, %v6554_v38 }
  0x53   :  { %5958 = vmatprep.subr.mxu1 %v6554_v38  ;;  %5963 = vmatprep.subr.mxu0 %v6554_v38 }
  0x54   :  { %5954 = vmatmul.mubr.f32.vlgmr.msra.gmra.mxu0 %v684_v30  ;;  %5959 = vmatpush3.msra.mxu1 %v6658_v22 }
  0x55   :  { %5960 = vmatprep.mubr.msk.f32.mxu1 %vm6555_vm4, %v6554_v38  ;;  %5964 = vmatpush3.msra.mxu0 %v6668_v32 }
  0x56   :  { %5961 = vmatmul.mubr.f32.vlgmr.msra.gmra.mxu1 %v685_v33  ;;  %5965 = vmatprep.subr.mxu0 %v6554_v38 }
  0x57   :  { %5970 = vmatprep.subr.mxu1 %v6554_v38  ;;  %5966 = vmatpush3.msra.mxu0 %v6671_v34 }
  0x58   :  { %5971 = vmatpush3.msra.mxu1 %v6651_v16  ;;  %5967 = vmatprep.mubr.msk.f32.mxu0 %vm6555_vm4, %v6554_v38 }
  0x59   :  { %5972 = vmatprep.subr.mxu1 %v6554_v38  ;;  %5968 = vmatmul.mubr.f32.vlgmr.msra.gmra.mxu0 %v6656_v21 }
  0x5a   :  { %5973 = vmatpush3.msra.mxu1 %v6658_v22  ;;  %5974 = vmatprep.mubr.msk.f32.mxu1 %vm6555_vm4, %v6554_v38 }
  0x5b   :  { %5984 = vmatprep.subr.mxu1 %v6554_v38  ;;  %5975 = vmatmul.mubr.f32.vlgmr.msra.gmra.mxu1 %v6656_v21 }
  0x5c   :  { %5977 = vmatprep.subr.mxu0 %v6554_v38  ;;  %5985 = vmatpush3.msra.mxu1 %v6678_v39 }
  0x5d   :  { %5988 = vmatprep.mubr.msk.f32.mxu1 %vm6555_vm4, %v6554_v38  ;;  %5986 = vmatprep.subr.mxu1 %v6554_v38 }
  0x5e   :  { %5978 = vmatpush3.msra.mxu0 %v6651_v16  ;;  %5987 = vmatpush3.msra.mxu1 %v6683_v41 }
  0x5f   :  { %5979 = vmatprep.subr.mxu0 %v6554_v38  ;;  %5998 = vmatprep.subr.mxu1 %v6554_v38 }
  0x60   :  { %5980 = vmatpush3.msra.mxu0 %v6658_v22  ;;  %5981 = vmatprep.mubr.msk.f32.mxu0 %vm6555_vm4, %v6554_v38 }
  0x61   :  { %5991 = vmatprep.subr.mxu0 %v6554_v38 }
 0x100   :  { %v5909_v43 = vpop.f32.mrf.mxu0 }
 0x101   :  { %v192_v44 = vadd.f32 %v5909_v43, %v5683_v42 }
 0x102   :  { %v5914_v45 = vpop.f32.mrf.mxu1  ;;  %v181_v46 = vpop.f32.mrf.mxu0 }
 0x103   :  { %v274_v47 = vadd.f32 %v5914_v45, %v192_v44  ;;  %v182_v48 = vadd.f32 %v5683_v42, %v181_v46 }
 0x104   :  { %v267_v49 = vpop.f32.mrf.mxu1  ;;  %v5919_v50 = vpop.f32.mrf.mxu0 }
 0x105   :  { %v268_v51 = vadd.f32 %v267_v49, %v182_v48  ;;  %v355_v52 = vadd.f32 %v5919_v50, %v274_v47 }
 0x106   :  { %v5924_v53 = vpop.f32.mrf.mxu1  ;;  %v347_v54 = vpop.f32.mrf.mxu0 }
 0x107   :  { %v437_v55 = vadd.f32 %v5924_v53, %v355_v52  ;;  %v348_v56 = vadd.f32 %v347_v54, %v268_v51 }
 0x108   :  { %v428_v57 = vpop.f32.mrf.mxu1  ;;  %v5929_v58 = vpop.f32.mrf.mxu0 }
 0x109   :  { %v429_v59 = vadd.f32 %v428_v57, %v348_v56  ;;  %v517_v60 = vadd.f32 %v5929_v58, %v437_v55 }
 0x10a   :  { %v5934_v61 = vpop.f32.mrf.mxu1  ;;  %v510_v62 = vpop.f32.mrf.mxu0 }
 0x10b   :  { %v6737_v63 = vadd.f32 %v5934_v61, %v517_v60  ;;  %v511_v0 = vadd.f32 %v510_v62, %v429_v59 }
 0x10c   :  { %v588_v1 = vpop.f32.mrf.mxu1 }
 0x10d   :  { %v6741_v3 = vadd.f32 %v588_v1, %v511_v0 }
 0x10e   :  { %v689_v4 = vpop.f32.mrf.mxu0 }
 0x10f   :  { %v690_v5 = vadd.f32 %v6739_v2, %v689_v4 }
 0x110   :  { %v770_v6 = vpop.f32.mrf.mxu1  ;;  %v5941_v7 = vpop.f32.mrf.mxu0 }
 0x111   :  { %v771_v8 = vadd.f32 %v770_v6, %v690_v5 }
 0x112   :  { %v5948_v9 = vpop.f32.mrf.mxu1 }
 0x114   :  { %v846_v10 = vpop.f32.mrf.mxu0 }
 0x115   :  { %v847_v12 = vadd.f32 %v846_v10, %v771_v8 }
 0x116   :  { %v921_v13 = vpop.f32.mrf.mxu1  ;;  %v5955_v14 = vpop.f32.mrf.mxu0 }
 0x117   :  { %v922_v15 = vadd.f32 %v921_v13, %v847_v12 }
 0x118   :  { %v5962_v17 = vpop.f32.mrf.mxu1 }
 0x119   :  { %v998_v18 = vpop.f32.mrf.mxu0 }
 0x11a   :  { %v999_v19 = vadd.f32 %v998_v18, %v922_v15 }
 0x11b   :  { %v1071_v20 = vpop.f32.mrf.mxu1  ;;  %v5969_v21 = vpop.f32.mrf.mxu0 }
 0x11c   :  { %v1072_v23 = vadd.f32 %v1071_v20, %v999_v19 }
 0x11d   :  { %v5976_v24 = vpop.f32.mrf.mxu1 }
 0x11e   :  { %1083 = vrot.lane.b32.xlu0 %v1072_v23, %s6556_s3  ;;  %v1075_v25 = vadd.f32 %v1072_v23, %v6741_v3 }
 0x120   :  { %v5685_v27 = vmul.f32 -1.442695, %v1075_v25 }
 0x122   :  { %6369 = vpow2.f32 %v5685_v27 }
 0x12f   :  { %v6370_v28 = vpop.eup %6369 }
 0x130   :  { %v1079_v29 = vadd.f32 1.0, %v6370_v28 }
 0x132   :  { %6371 = vrcp.f32 %v1079_v29 }
 0x13f   :  { %v6372_v30 = vpop.eup %6371 }
 0x140   :  { %v1093_v43 = vsub.f32 1.0, %v6372_v30 }
 0x190   :  { %v1084_v33 = vpop.permute.xlu0 %1083 }
 0x191   :  { %v1086_v35 = vmul.f32 %v6372_v30, %v1084_v33 }
 0x193   :  { %1088 = vrot.lane.b32.xlu0 %v1086_v35, %s6557_s25 }
 0x205   :  { %v1089_v36 = vpop.permute.xlu0 %1088 }
 0x206   :  { %v1091_v37 = vadd.f32 %v1089_v36, %v6741_v3 }
 0x208   :  { %6373 = vtanh.f32 %v1091_v37 }
 0x215   :  { %v6374_v40 = vpop.eup %6373 }
 0x216   :  { %1095 = vrot.lane.b32.xlu1 %v6374_v40, %s6558_s26 }
 0x21a   :  { %1099 = vrot.lane.b32.xlu1 %v6647_v11, %s6559_s27 }
 0x288   :  { %v1096_v42 = vpop.permute.xlu1 %1095 }
 0x289   :  { %v1098_v45 = vmul.f32 %v1096_v42, %v1093_v43 }
 0x28c   :  { %v1100_v44 = vpop.permute.xlu1 %1099 }
 0x28d   :  { %v1102_v46 = vmul.f32 %v6372_v30, %v1100_v44 }
 0x28f   :  { %v6750_v47 = vadd.f32 %v1102_v46, %v1098_v45 }
 0x291   :  { %1105 = vrot.lane.b32.xlu0 %v6750_v47, %s6558_s26  ;;  %v1597_v25 = vrot.slane %v6750_v47, 6 }
 0x303   :  { %v1106_v48 = vpop.permute.xlu0 %1105 }
 0x304   :  { %1109 = vst.msk [vmem:[#allocation2] sm:$0x3] %vm1108_vm5, %v1106_v48  ;;  %v1110_v49 = vsel %vm608_vm3, %v1106_v48, 0 }
 0x305   :  { %v1179_v50 = vand.u32 4294901760, %v1110_v49 }
 0x307   :  { %v1180_v51 = vsub.f32 %v1110_v49, %v1179_v50  ;;  %5989 = vmatmul.mubr.f32.vlgmr.msra.gmra.mxu1 %v1179_v50 }
 0x308   :  { %5999 = vmatpush3.msra.mxu1 %v6651_v16  ;;  %6002 = vmatprep.mubr.msk.f32.mxu1 %vm6555_vm4, %v6554_v38 }
 0x309   :  { %v1181_v11 = vand.u32 4294901760, %v1180_v51  ;;  %6000 = vmatprep.subr.mxu1 %v6554_v38 }
 0x30a   :  { %6001 = vmatpush3.msra.mxu1 %v6658_v22 }
 0x30b   :  { %v1182_v52 = vsub.f32 %v1180_v51, %v1181_v11  ;;  %6003 = vmatmul.mubr.f32.vlgmr.msra.gmra.mxu1 %v1181_v11  ;;  %6012 = vmatprep.subr.mxu1 %v6554_v38 }
 0x30c   :  { %6013 = vmatpush3.msra.mxu1 %v6651_v16  ;;  %6016 = vmatprep.mubr.msk.f32.mxu1 %vm6555_vm4, %v6554_v38 }
 0x30d   :  { %6014 = vmatprep.subr.mxu1 %v6554_v38  ;;  %v1183_v53 = vand.u32 4294901760, %v1182_v52 }
 0x30e   :  { %6015 = vmatpush3.msra.mxu1 %v6658_v22 }
 0x30f   :  { %5982 = vmatmul.mubr.f32.vlgmr.msra.gmra.mxu0 %v1183_v53  ;;  %6017 = vmatmul.mubr.f32.vlgmr.msra.gmra.mxu1 %v1179_v50 }
 0x310   :  { %5992 = vmatpush3.msra.mxu0 %v6661_v26  ;;  %5995 = vmatprep.mubr.msk.f32.mxu0 %vm6555_vm4, %v6554_v38 }
 0x311   :  { %5993 = vmatprep.subr.mxu0 %v6554_v38  ;;  %6026 = vmatprep.subr.mxu1 %v6554_v38 }
 0x312   :  { %5994 = vmatpush3.msra.mxu0 %v6665_v31  ;;  %6027 = vmatpush3.msra.mxu1 %v6678_v39 }
 0x313   :  { %6005 = vmatprep.subr.mxu0 %v6554_v38  ;;  %5996 = vmatmul.mubr.f32.vlgmr.msra.gmra.mxu0 %v1180_v51 }
 0x314   :  { %6006 = vmatpush3.msra.mxu0 %v6668_v32  ;;  %6009 = vmatprep.mubr.msk.f32.mxu0 %vm6555_vm4, %v6554_v38 }
 0x315   :  { %6007 = vmatprep.subr.mxu0 %v6554_v38  ;;  %6028 = vmatprep.subr.mxu1 %v6554_v38 }
 0x316   :  { %6008 = vmatpush3.msra.mxu0 %v6671_v34  ;;  %6029 = vmatpush3.msra.mxu1 %v6683_v41 }
 0x317   :  { %6010 = vmatmul.mubr.f32.vlgmr.msra.gmra.mxu0 %v1179_v50  ;;  %6030 = vmatprep.mubr.msk.f32.mxu1 %vm6555_vm4, %v6554_v38 }
 0x318   :  { %6040 = vmatprep.subr.mxu1 %v6554_v38  ;;  %6019 = vmatprep.subr.mxu0 %v6554_v38 }
 0x319   :  { %6020 = vmatpush3.msra.mxu0 %v6651_v16  ;;  %6023 = vmatprep.mubr.msk.f32.mxu0 %vm6555_vm4, %v6554_v38 }
 0x31a   :  { %6021 = vmatprep.subr.mxu0 %v6554_v38 }
 0x31b   :  { %6022 = vmatpush3.msra.mxu0 %v6658_v22 }
 0x31c   :  { %6033 = vmatprep.subr.mxu0 %v6554_v38 }
 0x3c7   :  { %v1266_v54 = vpop.f32.mrf.mxu1 }
 0x3c9   :  { %v5990_v55 = vpop.f32.mrf.mxu1 }
 0x3cb   :  { %v1417_v56 = vpop.f32.mrf.mxu1 }
 0x3cd   :  { %v6004_v57 = vpop.f32.mrf.mxu1 }
 0x3cf   :  { %v1185_v58 = vpop.f32.mrf.mxu0  ;;  %v1567_v59 = vpop.f32.mrf.mxu1 }
 0x3d0   :  { %v1186_v60 = vadd.f32 %v6739_v2, %v1185_v58 }
 0x3d1   :  { %v5983_v61 = vpop.f32.mrf.mxu0  ;;  %v6018_v62 = vpop.f32.mrf.mxu1 }
 0x3d2   :  { %v1267_v0 = vadd.f32 %v1266_v54, %v1186_v60 }
 0x3d3   :  { %v1342_v1 = vpop.f32.mrf.mxu0 }
 0x3d4   :  { %v1343_v4 = vadd.f32 %v1342_v1, %v1267_v0 }
 0x3d5   :  { %v5997_v5 = vpop.f32.mrf.mxu0 }
 0x3d6   :  { %v1418_v6 = vadd.f32 %v1417_v56, %v1343_v4 }
 0x3d7   :  { %v1494_v7 = vpop.f32.mrf.mxu0 }
 0x3d8   :  { %v1495_v8 = vadd.f32 %v1494_v7, %v1418_v6 }
 0x3d9   :  { %v6011_v9 = vpop.f32.mrf.mxu0 }
 0x3da   :  { %v1568_v10 = vadd.f32 %v1567_v59, %v1495_v8 }
 0x3dc   :  { %v1572_v12 = vrot.slane %v1568_v10, 6 }
 0x3de   :  { %1581 = vrot.lane.b32.xlu1 %v1572_v12, %s6556_s3  ;;  %v1574_v13 = vadd.f32 %v1572_v12, %v6741_v3 }
 0x3e0   :  { %v5686_v14 = vmul.f32 -1.442695, %v1574_v13 }
 0x3e2   :  { %6375 = vpow2.f32 %v5686_v14 }
 0x3ef   :  { %v6376_v15 = vpop.eup %6375 }
 0x3f0   :  { %v1578_v17 = vadd.f32 1.0, %v6376_v15 }
 0x3f2   :  { %6377 = vrcp.f32 %v1578_v17 }
 0x3ff   :  { %v6378_v18 = vpop.eup %6377 }
 0x400   :  { %v1591_v27 = vsub.f32 1.0, %v6378_v18  ;;  %v1599_v30 = vmul.f32 %v6378_v18, %v1597_v25 }
 0x450   :  { %v1582_v19 = vpop.permute.xlu1 %1581 }
 0x451   :  { %v1584_v20 = vmul.f32 %v6378_v18, %v1582_v19 }
 0x453   :  { %1586 = vrot.lane.b32.xlu0 %v1584_v20, %s6557_s25 }
 0x4c5   :  { %v1587_v21 = vpop.permute.xlu0 %1586 }
 0x4c6   :  { %v1589_v23 = vadd.f32 %v1587_v21, %v6741_v3 }
 0x4c8   :  { %6379 = vtanh.f32 %v1589_v23 }
 0x4d5   :  { %v6380_v24 = vpop.eup %6379 }
 0x4d6   :  { %1593 = vrot.lane.b32.xlu1 %v6380_v24, %s6558_s26 }
 0x548   :  { %v1594_v28 = vpop.permute.xlu1 %1593 }
 0x549   :  { %v1596_v29 = vmul.f32 %v1594_v28, %v1591_v27 }
 0x54b   :  { %v6799_v33 = vadd.f32 %v1599_v30, %v1596_v29 }
 0x54d   :  { %v1607_v35 = vrot.slane %v6799_v33, 2  ;;  %v2097_v15 = vrot.slane %v6799_v33, 6 }
 0x54f   :  { %1608 = vrot.lane.b32.xlu0 %v1607_v35, %s6558_s26 }
 0x5c1   :  { %v1609_v36 = vpop.permute.xlu0 %1608 }
 0x5c2   :  { %v1610_v37 = vsel %vm608_vm3, %v1609_v36, 0 }
 0x5c3   :  { %v1679_v40 = vand.u32 4294901760, %v1610_v37 }
 0x5c5   :  { %v1680_v42 = vsub.f32 %v1610_v37, %v1679_v40  ;;  %6031 = vmatmul.mubr.f32.vlgmr.msra.gmra.mxu1 %v1679_v40 }
 0x5c6   :  { %6041 = vmatpush3.msra.mxu1 %v6651_v16  ;;  %6044 = vmatprep.mubr.msk.f32.mxu1 %vm6555_vm4, %v6554_v38 }
 0x5c7   :  { %v1681_v43 = vand.u32 4294901760, %v1680_v42  ;;  %6042 = vmatprep.subr.mxu1 %v6554_v38 }
 0x5c8   :  { %6043 = vmatpush3.msra.mxu1 %v6658_v22 }
 0x5c9   :  { %v1682_v44 = vsub.f32 %v1680_v42, %v1681_v43  ;;  %6045 = vmatmul.mubr.f32.vlgmr.msra.gmra.mxu1 %v1681_v43  ;;  %6054 = vmatprep.subr.mxu1 %v6554_v38 }
 0x5ca   :  { %6055 = vmatpush3.msra.mxu1 %v6651_v16  ;;  %6058 = vmatprep.mubr.msk.f32.mxu1 %vm6555_vm4, %v6554_v38 }
 0x5cb   :  { %v1683_v45 = vand.u32 4294901760, %v1682_v44  ;;  %6056 = vmatprep.subr.mxu1 %v6554_v38 }
 0x5cc   :  { %6057 = vmatpush3.msra.mxu1 %v6658_v22 }
 0x5cd   :  { %6024 = vmatmul.mubr.f32.vlgmr.msra.gmra.mxu0 %v1683_v45  ;;  %6059 = vmatmul.mubr.f32.vlgmr.msra.gmra.mxu1 %v1679_v40 }
 0x5ce   :  { %6034 = vmatpush3.msra.mxu0 %v6661_v26  ;;  %6037 = vmatprep.mubr.msk.f32.mxu0 %vm6555_vm4, %v6554_v38 }
 0x5cf   :  { %6035 = vmatprep.subr.mxu0 %v6554_v38  ;;  %6068 = vmatprep.subr.mxu1 %v6554_v38 }
 0x5d0   :  { %6036 = vmatpush3.msra.mxu0 %v6665_v31  ;;  %6069 = vmatpush3.msra.mxu1 %v6678_v39 }
 0x5d1   :  { %6047 = vmatprep.subr.mxu0 %v6554_v38  ;;  %6038 = vmatmul.mubr.f32.vlgmr.msra.gmra.mxu0 %v1680_v42 }
 0x5d2   :  { %6048 = vmatpush3.msra.mxu0 %v6668_v32  ;;  %6051 = vmatprep.mubr.msk.f32.mxu0 %vm6555_vm4, %v6554_v38 }
 0x5d3   :  { %6049 = vmatprep.subr.mxu0 %v6554_v38  ;;  %6070 = vmatprep.subr.mxu1 %v6554_v38 }
 0x5d4   :  { %6050 = vmatpush3.msra.mxu0 %v6671_v34  ;;  %6071 = vmatpush3.msra.mxu1 %v6683_v41 }
 0x5d5   :  { %6052 = vmatmul.mubr.f32.vlgmr.msra.gmra.mxu0 %v1679_v40  ;;  %6072 = vmatprep.mubr.msk.f32.mxu1 %vm6555_vm4, %v6554_v38 }
 0x5d6   :  { %6082 = vmatprep.subr.mxu1 %v6554_v38  ;;  %6061 = vmatprep.subr.mxu0 %v6554_v38 }
 0x5d7   :  { %6062 = vmatpush3.msra.mxu0 %v6651_v16  ;;  %6065 = vmatprep.mubr.msk.f32.mxu0 %vm6555_vm4, %v6554_v38 }
 0x5d8   :  { %6063 = vmatprep.subr.mxu0 %v6554_v38 }
 0x5d9   :  { %6064 = vmatpush3.msra.mxu0 %v6658_v22 }
 0x5da   :  { %6075 = vmatprep.subr.mxu0 %v6554_v38 }
 0x685   :  { %v1766_v46 = vpop.f32.mrf.mxu1 }
 0x687   :  { %v6032_v47 = vpop.f32.mrf.mxu1 }
 0x689   :  { %v1917_v48 = vpop.f32.mrf.mxu1 }
 0x68b   :  { %v6046_v49 = vpop.f32.mrf.mxu1 }
 0x68d   :  { %v1685_v50 = vpop.f32.mrf.mxu0  ;;  %v2067_v51 = vpop.f32.mrf.mxu1 }
 0x68e   :  { %v1686_v11 = vadd.f32 %v6739_v2, %v1685_v50 }
 0x68f   :  { %v6025_v52 = vpop.f32.mrf.mxu0  ;;  %v6060_v53 = vpop.f32.mrf.mxu1 }
 0x690   :  { %v1767_v54 = vadd.f32 %v1766_v46, %v1686_v11 }
 0x691   :  { %v1842_v55 = vpop.f32.mrf.mxu0 }
 0x692   :  { %v1843_v56 = vadd.f32 %v1842_v55, %v1767_v54 }
 0x693   :  { %v6039_v57 = vpop.f32.mrf.mxu0 }
 0x694   :  { %v1918_v58 = vadd.f32 %v1917_v48, %v1843_v56 }
 0x695   :  { %v1994_v59 = vpop.f32.mrf.mxu0 }
 0x696   :  { %v1995_v60 = vadd.f32 %v1994_v59, %v1918_v58 }
 0x697   :  { %v6053_v61 = vpop.f32.mrf.mxu0 }
 0x698   :  { %v2068_v62 = vadd.f32 %v2067_v51, %v1995_v60 }
 0x69a   :  { %v2072_v0 = vrot.slane %v2068_v62, 4 }
 0x69c   :  { %2081 = vrot.lane.b32.xlu1 %v2072_v0, %s6556_s3  ;;  %v2074_v1 = vadd.f32 %v2072_v0, %v6741_v3 }
 0x69e   :  { %v5687_v4 = vmul.f32 -1.442695, %v2074_v1 }
 0x6a0   :  { %6381 = vpow2.f32 %v5687_v4 }
 0x6ad   :  { %v6382_v5 = vpop.eup %6381 }
 0x6ae   :  { %v2078_v6 = vadd.f32 1.0, %v6382_v5 }
 0x6b0   :  { %6383 = vrcp.f32 %v2078_v6 }
 0x6bd   :  { %v6384_v7 = vpop.eup %6383 }
 0x6be   :  { %v2091_v14 = vsub.f32 1.0, %v6384_v7  ;;  %v2099_v18 = vmul.f32 %v6384_v7, %v2097_v15 }
 0x70e   :  { %v2082_v8 = vpop.permute.xlu1 %2081 }
 0x70f   :  { %v2084_v9 = vmul.f32 %v6384_v7, %v2082_v8 }
 0x711   :  { %2086 = vrot.lane.b32.xlu0 %v2084_v9, %s6557_s25 }
 0x783   :  { %v2087_v10 = vpop.permute.xlu0 %2086 }
 0x784   :  { %v2089_v12 = vadd.f32 %v2087_v10, %v6741_v3 }
 0x786   :  { %6385 = vtanh.f32 %v2089_v12 }
 0x793   :  { %v6386_v13 = vpop.eup %6385 }
 0x794   :  { %2093 = vrot.lane.b32.xlu1 %v6386_v13, %s6558_s26 }
 0x806   :  { %v2094_v17 = vpop.permute.xlu1 %2093 }
 0x807   :  { %v2096_v19 = vmul.f32 %v2094_v17, %v2091_v14 }
 0x809   :  { %v6847_v20 = vadd.f32 %v2099_v18, %v2096_v19 }
 0x80b   :  { %v2107_v21 = vrot.slane %v6847_v20, 4  ;;  %v2597_v6 = vrot.slane %v6847_v20, 6 }
 0x80d   :  { %2108 = vrot.lane.b32.xlu0 %v2107_v21, %s6558_s26 }
 0x87f   :  { %v2109_v23 = vpop.permute.xlu0 %2108 }
 0x880   :  { %v2110_v24 = vsel %vm608_vm3, %v2109_v23, 0 }
 0x881   :  { %v2179_v25 = vand.u32 4294901760, %v2110_v24 }
 0x883   :  { %v2180_v27 = vsub.f32 %v2110_v24, %v2179_v25  ;;  %6073 = vmatmul.mubr.f32.vlgmr.msra.gmra.mxu1 %v2179_v25 }
 0x884   :  { %6083 = vmatpush3.msra.mxu1 %v6651_v16  ;;  %6086 = vmatprep.mubr.msk.f32.mxu1 %vm6555_vm4, %v6554_v38 }
 0x885   :  { %v2181_v28 = vand.u32 4294901760, %v2180_v27  ;;  %6084 = vmatprep.subr.mxu1 %v6554_v38 }
 0x886   :  { %6085 = vmatpush3.msra.mxu1 %v6658_v22 }
 0x887   :  { %v2182_v29 = vsub.f32 %v2180_v27, %v2181_v28  ;;  %6087 = vmatmul.mubr.f32.vlgmr.msra.gmra.mxu1 %v2181_v28  ;;  %6096 = vmatprep.subr.mxu1 %v6554_v38 }
 0x888   :  { %6097 = vmatpush3.msra.mxu1 %v6651_v16  ;;  %6100 = vmatprep.mubr.msk.f32.mxu1 %vm6555_vm4, %v6554_v38 }
 0x889   :  { %v2183_v30 = vand.u32 4294901760, %v2182_v29  ;;  %6098 = vmatprep.subr.mxu1 %v6554_v38 }
 0x88a   :  { %6099 = vmatpush3.msra.mxu1 %v6658_v22 }
 0x88b   :  { %6066 = vmatmul.mubr.f32.vlgmr.msra.gmra.mxu0 %v2183_v30  ;;  %6101 = vmatmul.mubr.f32.vlgmr.msra.gmra.mxu1 %v2179_v25 }
 0x88c   :  { %6076 = vmatpush3.msra.mxu0 %v6661_v26  ;;  %6079 = vmatprep.mubr.msk.f32.mxu0 %vm6555_vm4, %v6554_v38 }
 0x88d   :  { %6077 = vmatprep.subr.mxu0 %v6554_v38  ;;  %6110 = vmatprep.subr.mxu1 %v6554_v38 }
 0x88e   :  { %6078 = vmatpush3.msra.mxu0 %v6665_v31  ;;  %6111 = vmatpush3.msra.mxu1 %v6678_v39 }
 0x88f   :  { %6089 = vmatprep.subr.mxu0 %v6554_v38  ;;  %6080 = vmatmul.mubr.f32.vlgmr.msra.gmra.mxu0 %v2180_v27 }
 0x890   :  { %6090 = vmatpush3.msra.mxu0 %v6668_v32  ;;  %6093 = vmatprep.mubr.msk.f32.mxu0 %vm6555_vm4, %v6554_v38 }
 0x891   :  { %6091 = vmatprep.subr.mxu0 %v6554_v38  ;;  %6112 = vmatprep.subr.mxu1 %v6554_v38 }
 0x892   :  { %6092 = vmatpush3.msra.mxu0 %v6671_v34  ;;  %6113 = vmatpush3.msra.mxu1 %v6683_v41 }
 0x893   :  { %6094 = vmatmul.mubr.f32.vlgmr.msra.gmra.mxu0 %v2179_v25  ;;  %6114 = vmatprep.mubr.msk.f32.mxu1 %vm6555_vm4, %v6554_v38 }
 0x894   :  { %6124 = vmatprep.subr.mxu1 %v6554_v38  ;;  %6103 = vmatprep.subr.mxu0 %v6554_v38 }
 0x895   :  { %6104 = vmatpush3.msra.mxu0 %v6651_v16  ;;  %6107 = vmatprep.mubr.msk.f32.mxu0 %vm6555_vm4, %v6554_v38 }
 0x896   :  { %6105 = vmatprep.subr.mxu0 %v6554_v38 }
 0x897   :  { %6106 = vmatpush3.msra.mxu0 %v6658_v22 }
 0x898   :  { %6117 = vmatprep.subr.mxu0 %v6554_v38 }
 0x943   :  { %v2266_v35 = vpop.f32.mrf.mxu1 }
 0x945   :  { %v6074_v36 = vpop.f32.mrf.mxu1 }
 0x947   :  { %v2417_v37 = vpop.f32.mrf.mxu1 }
 0x949   :  { %v6088_v40 = vpop.f32.mrf.mxu1 }
 0x94b   :  { %v2185_v42 = vpop.f32.mrf.mxu0  ;;  %v2567_v43 = vpop.f32.mrf.mxu1 }
 0x94c   :  { %v2186_v44 = vadd.f32 %v6739_v2, %v2185_v42 }
 0x94d   :  { %v6067_v45 = vpop.f32.mrf.mxu0  ;;  %v6102_v46 = vpop.f32.mrf.mxu1 }
 0x94e   :  { %v2267_v47 = vadd.f32 %v2266_v35, %v2186_v44 }
 0x94f   :  { %v2342_v48 = vpop.f32.mrf.mxu0 }
 0x950   :  { %v2343_v49 = vadd.f32 %v2342_v48, %v2267_v47 }
 0x951   :  { %v6081_v50 = vpop.f32.mrf.mxu0 }
 0x952   :  { %v2418_v51 = vadd.f32 %v2417_v37, %v2343_v49 }
 0x953   :  { %v2494_v11 = vpop.f32.mrf.mxu0 }
 0x954   :  { %v2495_v52 = vadd.f32 %v2494_v11, %v2418_v51 }
 0x955   :  { %v6095_v53 = vpop.f32.mrf.mxu0 }
 0x956   :  { %v2568_v54 = vadd.f32 %v2567_v43, %v2495_v52 }
 0x958   :  { %v2572_v55 = vrot.slane %v2568_v54, 2 }
 0x95a   :  { %2581 = vrot.lane.b32.xlu1 %v2572_v55, %s6556_s3  ;;  %v2574_v56 = vadd.f32 %v2572_v55, %v6741_v3 }
 0x95c   :  { %v5688_v57 = vmul.f32 -1.442695, %v2574_v56 }
 0x95e   :  { %6387 = vpow2.f32 %v5688_v57 }
 0x96b   :  { %v6388_v58 = vpop.eup %6387 }
 0x96c   :  { %v2578_v59 = vadd.f32 1.0, %v6388_v58 }
 0x96e   :  { %6389 = vrcp.f32 %v2578_v59 }
 0x97b   :  { %v6390_v60 = vpop.eup %6389 }
 0x97c   :  { %v2591_v5 = vsub.f32 1.0, %v6390_v60  ;;  %v2599_v8 = vmul.f32 %v6390_v60, %v2597_v6 }
 0x9cc   :  { %v2582_v61 = vpop.permute.xlu1 %2581 }
 0x9cd   :  { %v2584_v62 = vmul.f32 %v6390_v60, %v2582_v61 }
 0x9cf   :  { %2586 = vrot.lane.b32.xlu0 %v2584_v62, %s6557_s25 }
 0xa41   :  { %v2587_v0 = vpop.permute.xlu0 %2586 }
 0xa42   :  { %v2589_v1 = vadd.f32 %v2587_v0, %v6741_v3 }
 0xa44   :  { %6391 = vtanh.f32 %v2589_v1 }
 0xa51   :  { %v6392_v4 = vpop.eup %6391 }
 0xa52   :  { %2593 = vrot.lane.b32.xlu1 %v6392_v4, %s6558_s26 }
 0xac4   :  { %v2594_v7 = vpop.permute.xlu1 %2593 }
 0xac5   :  { %v2596_v9 = vmul.f32 %v2594_v7, %v2591_v5 }
 0xac7   :  { %v6895_v10 = vadd.f32 %v2599_v8, %v2596_v9 }
 0xac9   :  { %v2607_v12 = vrot.slane %v6895_v10, 6 }
 0xacb   :  { %2608 = vrot.lane.b32.xlu0 %v2607_v12, %s6558_s26 }
 0xb3d   :  { %v2609_v13 = vpop.permute.xlu0 %2608 }
 0xb3e   :  { %v2610_v3 = vsel %vm608_vm3, %v2609_v13, 0 }
 0xb3f   :  { %v2679_v14 = vand.u32 4294901760, %v2610_v3 }
 0xb41   :  { %v2680_v15 = vsub.f32 %v2610_v3, %v2679_v14  ;;  %6115 = vmatmul.mubr.f32.vlgmr.msra.gmra.mxu1 %v2679_v14 }
 0xb42   :  { %6125 = vmatpush3.msra.mxu1 %v6651_v16  ;;  %6128 = vmatprep.mubr.msk.f32.mxu1 %vm6555_vm4, %v6554_v38 }
 0xb43   :  { %v2681_v17 = vand.u32 4294901760, %v2680_v15  ;;  %6126 = vmatprep.subr.mxu1 %v6554_v38 }
 0xb44   :  { %6127 = vmatpush3.msra.mxu1 %v6658_v22 }
 0xb45   :  { %v2682_v18 = vsub.f32 %v2680_v15, %v2681_v17  ;;  %6129 = vmatmul.mubr.f32.vlgmr.msra.gmra.mxu1 %v2681_v17  ;;  %6138 = vmatprep.subr.mxu1 %v6554_v38 }
 0xb46   :  { %6139 = vmatpush3.msra.mxu1 %v6651_v16  ;;  %6142 = vmatprep.mubr.msk.f32.mxu1 %vm6555_vm4, %v6554_v38 }
 0xb47   :  { %v2683_v19 = vand.u32 4294901760, %v2682_v18  ;;  %6140 = vmatprep.subr.mxu1 %v6554_v38 }
 0xb48   :  { %6141 = vmatpush3.msra.mxu1 %v6658_v22 }
 0xb49   :  { %6108 = vmatmul.mubr.f32.vlgmr.msra.gmra.mxu0 %v2683_v19  ;;  %6143 = vmatmul.mubr.f32.vlgmr.msra.gmra.mxu1 %v2679_v14 }
 0xb4a   :  { %6118 = vmatpush3.msra.mxu0 %v6661_v26  ;;  %6121 = vmatprep.mubr.msk.f32.mxu0 %vm6555_vm4, %v6554_v38 }
 0xb4b   :  { %6119 = vmatprep.subr.mxu0 %v6554_v38  ;;  %6152 = vmatprep.subr.mxu1 %v6554_v38 }
 0xb4c   :  { %6120 = vmatpush3.msra.mxu0 %v6665_v31  ;;  %6153 = vmatpush3.msra.mxu1 %v6678_v39 }
 0xb4d   :  { %6131 = vmatprep.subr.mxu0 %v6554_v38  ;;  %6122 = vmatmul.mubr.f32.vlgmr.msra.gmra.mxu0 %v2680_v15 }
 0xb4e   :  { %6132 = vmatpush3.msra.mxu0 %v6668_v32  ;;  %6135 = vmatprep.mubr.msk.f32.mxu0 %vm6555_vm4, %v6554_v38 }
 0xb4f   :  { %6133 = vmatprep.subr.mxu0 %v6554_v38  ;;  %6154 = vmatprep.subr.mxu1 %v6554_v38 }
 0xb50   :  { %6134 = vmatpush3.msra.mxu0 %v6671_v34  ;;  %6155 = vmatpush3.msra.mxu1 %v6683_v41 }
 0xb51   :  { %6136 = vmatmul.mubr.f32.vlgmr.msra.gmra.mxu0 %v2679_v14  ;;  %6156 = vmatprep.mubr.msk.f32.mxu1 %vm6555_vm4, %v6554_v38 }
 0xb52   :  { %6166 = vmatprep.subr.mxu1 %v6554_v38  ;;  %6145 = vmatprep.subr.mxu0 %v6554_v38 }
 0xb53   :  { %6146 = vmatpush3.msra.mxu0 %v6651_v16  ;;  %6149 = vmatprep.mubr.msk.f32.mxu0 %vm6555_vm4, %v6554_v38 }
 0xb54   :  { %6147 = vmatprep.subr.mxu0 %v6554_v38 }
 0xb55   :  { %6148 = vmatpush3.msra.mxu0 %v6658_v22 }
 0xb56   :  { %6159 = vmatprep.subr.mxu0 %v6554_v38 }
 0xc01   :  { %v2766_v21 = vpop.f32.mrf.mxu1 }
 0xc03   :  { %v6116_v23 = vpop.f32.mrf.mxu1 }
 0xc05   :  { %v2917_v24 = vpop.f32.mrf.mxu1 }
 0xc07   :  { %v6130_v25 = vpop.f32.mrf.mxu1 }
 0xc09   :  { %v2685_v27 = vpop.f32.mrf.mxu0  ;;  %v3067_v28 = vpop.f32.mrf.mxu1 }
 0xc0a   :  { %v2686_v29 = vadd.f32 %v6739_v2, %v2685_v27 }
 0xc0b   :  { %v6109_v30 = vpop.f32.mrf.mxu0  ;;  %v6144_v35 = vpop.f32.mrf.mxu1 }
 0xc0c   :  { %v2767_v36 = vadd.f32 %v2766_v21, %v2686_v29 }
 0xc0d   :  { %v2842_v37 = vpop.f32.mrf.mxu0 }
 0xc0e   :  { %v2843_v40 = vadd.f32 %v2842_v37, %v2767_v36 }
 0xc0f   :  { %v6123_v42 = vpop.f32.mrf.mxu0 }
 0xc10   :  { %v2918_v43 = vadd.f32 %v2917_v24, %v2843_v40 }
 0xc11   :  { %v2994_v44 = vpop.f32.mrf.mxu0 }
 0xc12   :  { %v2995_v45 = vadd.f32 %v2994_v44, %v2918_v43 }
 0xc13   :  { %v6137_v46 = vpop.f32.mrf.mxu0 }
 0xc14   :  { %v3068_v47 = vadd.f32 %v3067_v28, %v2995_v45 }
 0xc16   :  { %3079 = vrot.lane.b32.xlu1 %v3068_v47, %s6556_s3  ;;  %v3071_v48 = vadd.f32 %v3068_v47, %v6737_v63 }
 0xc18   :  { %v5689_v49 = vmul.f32 -1.442695, %v3071_v48 }
 0xc1a   :  { %6393 = vpow2.f32 %v5689_v49 }
 0xc27   :  { %v6394_v50 = vpop.eup %6393 }
 0xc28   :  { %v3075_v51 = vadd.f32 1.0, %v6394_v50 }
 0xc2a   :  { %6395 = vrcp.f32 %v3075_v51 }
 0xc37   :  { %v6396_v11 = vpop.eup %6395 }
 0xc38   :  { %v3089_v57 = vsub.f32 1.0, %v6396_v11  ;;  %v3096_v59 = vmul.f32 %v6396_v11, %v2607_v12 }
 0xc88   :  { %v3080_v52 = vpop.permute.xlu1 %3079 }
 0xc89   :  { %v3082_v53 = vmul.f32 %v6396_v11, %v3080_v52 }
 0xc8b   :  { %3084 = vrot.lane.b32.xlu0 %v3082_v53, %s6557_s25 }
 0xcfd   :  { %v3085_v54 = vpop.permute.xlu0 %3084 }
 0xcfe   :  { %v3087_v55 = vadd.f32 %v3085_v54, %v6737_v63 }
 0xd00   :  { %6397 = vtanh.f32 %v3087_v55 }
 0xd0d   :  { %v6398_v56 = vpop.eup %6397 }
 0xd0e   :  { %3091 = vrot.lane.b32.xlu1 %v6398_v56, %s6558_s26 }
 0xd80   :  { %v3092_v58 = vpop.permute.xlu1 %3091 }
 0xd81   :  { %v3094_v60 = vmul.f32 %v3092_v58, %v3089_v57 }
 0xd83   :  { %v6946_v61 = vadd.f32 %v3096_v59, %v3094_v60 }
 0xd85   :  { %3099 = vrot.lane.b32.xlu0 %v6946_v61, %s6558_s26  ;;  %v3590_v48 = vrot.slane %v6946_v61, 6 }
 0xdf7   :  { %v3100_v62 = vpop.permute.xlu0 %3099 }
 0xdf8   :  { %3102 = vst.msk [vmem:[#allocation2 + $0x8] sm:$0x3] %vm1108_vm5, %v3100_v62  ;;  %v3103_v0 = vsel %vm608_vm3, %v3100_v62, 0 }
 0xdf9   :  { %v3172_v1 = vand.u32 4294901760, %v3103_v0 }
 0xdfb   :  { %v3173_v4 = vsub.f32 %v3103_v0, %v3172_v1  ;;  %6157 = vmatmul.mubr.f32.vlgmr.msra.gmra.mxu1 %v3172_v1 }
 0xdfc   :  { %6167 = vmatpush3.msra.mxu1 %v6651_v16  ;;  %6170 = vmatprep.mubr.msk.f32.mxu1 %vm6555_vm4, %v6554_v38 }
 0xdfd   :  { %v3174_v5 = vand.u32 4294901760, %v3173_v4  ;;  %6168 = vmatprep.subr.mxu1 %v6554_v38 }
 0xdfe   :  { %6169 = vmatpush3.msra.mxu1 %v6658_v22 }
 0xdff   :  { %v3175_v6 = vsub.f32 %v3173_v4, %v3174_v5  ;;  %6171 = vmatmul.mubr.f32.vlgmr.msra.gmra.mxu1 %v3174_v5  ;;  %6180 = vmatprep.subr.mxu1 %v6554_v38 }
 0xe00   :  { %6181 = vmatpush3.msra.mxu1 %v6651_v16  ;;  %6184 = vmatprep.mubr.msk.f32.mxu1 %vm6555_vm4, %v6554_v38 }
 0xe01   :  { %6182 = vmatprep.subr.mxu1 %v6554_v38  ;;  %v3176_v7 = vand.u32 4294901760, %v3175_v6 }
 0xe02   :  { %6183 = vmatpush3.msra.mxu1 %v6658_v22 }
 0xe03   :  { %6150 = vmatmul.mubr.f32.vlgmr.msra.gmra.mxu0 %v3176_v7  ;;  %6185 = vmatmul.mubr.f32.vlgmr.msra.gmra.mxu1 %v3172_v1 }
 0xe04   :  { %6160 = vmatpush3.msra.mxu0 %v6661_v26  ;;  %6163 = vmatprep.mubr.msk.f32.mxu0 %vm6555_vm4, %v6554_v38 }
 0xe05   :  { %6161 = vmatprep.subr.mxu0 %v6554_v38  ;;  %6194 = vmatprep.subr.mxu1 %v6554_v38 }
 0xe06   :  { %6162 = vmatpush3.msra.mxu0 %v6665_v31  ;;  %6195 = vmatpush3.msra.mxu1 %v6678_v39 }
 0xe07   :  { %6173 = vmatprep.subr.mxu0 %v6554_v38  ;;  %6164 = vmatmul.mubr.f32.vlgmr.msra.gmra.mxu0 %v3173_v4  ;;  %v7036_v4 = vld [vmem:[#allocation8] ss:$0 sm:$0xff] }
 0xe08   :  { %6174 = vmatpush3.msra.mxu0 %v6668_v32  ;;  %6177 = vmatprep.mubr.msk.f32.mxu0 %vm6555_vm4, %v6554_v38 }
 0xe09   :  { %6175 = vmatprep.subr.mxu0 %v6554_v38  ;;  %6196 = vmatprep.subr.mxu1 %v6554_v38 }
 0xe0a   :  { %6176 = vmatpush3.msra.mxu0 %v6671_v34  ;;  %6197 = vmatpush3.msra.mxu1 %v6683_v41 }
 0xe0b   :  { %6178 = vmatmul.mubr.f32.vlgmr.msra.gmra.mxu0 %v3172_v1  ;;  %6198 = vmatprep.mubr.msk.f32.mxu1 %vm6555_vm4, %v6554_v38 }
 0xe0c   :  { %6208 = vmatprep.subr.mxu1 %v6554_v38  ;;  %6187 = vmatprep.subr.mxu0 %v6554_v38 }
 0xe0d   :  { %6188 = vmatpush3.msra.mxu0 %v6651_v16  ;;  %6191 = vmatprep.mubr.msk.f32.mxu0 %vm6555_vm4, %v6554_v38 }
 0xe0e   :  { %6189 = vmatprep.subr.mxu0 %v6554_v38 }
 0xe0f   :  { %6190 = vmatpush3.msra.mxu0 %v6658_v22 }
 0xe10   :  { %6201 = vmatprep.subr.mxu0 %v6554_v38 }
 0xebb   :  { %v3259_v8 = vpop.f32.mrf.mxu1 }
 0xebd   :  { %v6158_v9 = vpop.f32.mrf.mxu1 }
 0xebf   :  { %v3410_v12 = vpop.f32.mrf.mxu1 }
 0xec1   :  { %v6172_v13 = vpop.f32.mrf.mxu1 }
 0xec3   :  { %v3178_v3 = vpop.f32.mrf.mxu0  ;;  %v3560_v14 = vpop.f32.mrf.mxu1 }
 0xec4   :  { %v3179_v15 = vadd.f32 %v6739_v2, %v3178_v3 }
 0xec5   :  { %v6151_v17 = vpop.f32.mrf.mxu0  ;;  %v6186_v18 = vpop.f32.mrf.mxu1 }
 0xec6   :  { %v3260_v19 = vadd.f32 %v3259_v8, %v3179_v15 }
 0xec7   :  { %v3335_v21 = vpop.f32.mrf.mxu0 }
 0xec8   :  { %v3336_v23 = vadd.f32 %v3335_v21, %v3260_v19 }
 0xec9   :  { %v6165_v24 = vpop.f32.mrf.mxu0 }
 0xeca   :  { %v3411_v25 = vadd.f32 %v3410_v12, %v3336_v23 }
 0xecb   :  { %v3487_v27 = vpop.f32.mrf.mxu0 }
 0xecc   :  { %v3488_v28 = vadd.f32 %v3487_v27, %v3411_v25 }
 0xecd   :  { %v6179_v29 = vpop.f32.mrf.mxu0 }
 0xece   :  { %v3561_v30 = vadd.f32 %v3560_v14, %v3488_v28 }
 0xed0   :  { %v3565_v35 = vrot.slane %v3561_v30, 6 }
 0xed2   :  { %3574 = vrot.lane.b32.xlu1 %v3565_v35, %s6556_s3  ;;  %v3567_v36 = vadd.f32 %v3565_v35, %v6737_v63 }
 0xed4   :  { %v5690_v37 = vmul.f32 -1.442695, %v3567_v36 }
 0xed6   :  { %6399 = vpow2.f32 %v5690_v37 }
 0xee3   :  { %v6400_v40 = vpop.eup %6399 }
 0xee4   :  { %v3571_v2 = vadd.f32 1.0, %v6400_v40 }
 0xee6   :  { %6401 = vrcp.f32 %v3571_v2 }
 0xef3   :  { %v6402_v42 = vpop.eup %6401 }
 0xef4   :  { %v3584_v49 = vsub.f32 1.0, %v6402_v42  ;;  %v3592_v51 = vmul.f32 %v6402_v42, %v3590_v48 }
 0xf44   :  { %v3575_v43 = vpop.permute.xlu1 %3574 }
 0xf45   :  { %v3577_v44 = vmul.f32 %v6402_v42, %v3575_v43 }
 0xf47   :  { %3579 = vrot.lane.b32.xlu0 %v3577_v44, %s6557_s25 }
 0xfb9   :  { %v3580_v45 = vpop.permute.xlu0 %3579 }
 0xfba   :  { %v3582_v46 = vadd.f32 %v3580_v45, %v6737_v63 }
 0xfbc   :  { %6403 = vtanh.f32 %v3582_v46 }
 0xfc9   :  { %v6404_v47 = vpop.eup %6403 }
 0xfca   :  { %3586 = vrot.lane.b32.xlu1 %v6404_v47, %s6558_s26 }
0x103c   :  { %v3587_v50 = vpop.permute.xlu1 %3586 }
0x103d   :  { %v3589_v11 = vmul.f32 %v3587_v50, %v3584_v49 }
0x103f   :  { %v6995_v52 = vadd.f32 %v3592_v51, %v3589_v11 }
0x1041   :  { %v3599_v53 = vrot.slane %v6995_v52, 2  ;;  %v4089_v40 = vrot.slane %v6995_v52, 6 }
0x1043   :  { %3600 = vrot.lane.b32.xlu0 %v3599_v53, %s6558_s26 }
0x10b5   :  { %v3601_v54 = vpop.permute.xlu0 %3600 }
0x10b6   :  { %v3602_v55 = vsel %vm608_vm3, %v3601_v54, 0 }
0x10b7   :  { %v3671_v56 = vand.u32 4294901760, %v3602_v55 }
0x10b9   :  { %v3672_v57 = vsub.f32 %v3602_v55, %v3671_v56  ;;  %6199 = vmatmul.mubr.f32.vlgmr.msra.gmra.mxu1 %v3671_v56 }
0x10ba   :  { %6209 = vmatpush3.msra.mxu1 %v6651_v16  ;;  %6212 = vmatprep.mubr.msk.f32.mxu1 %vm6555_vm4, %v6554_v38 }
0x10bb   :  { %v3673_v58 = vand.u32 4294901760, %v3672_v57  ;;  %6210 = vmatprep.subr.mxu1 %v6554_v38 }
0x10bc   :  { %6211 = vmatpush3.msra.mxu1 %v6658_v22 }
0x10bd   :  { %v3674_v59 = vsub.f32 %v3672_v57, %v3673_v58  ;;  %6213 = vmatmul.mubr.f32.vlgmr.msra.gmra.mxu1 %v3673_v58  ;;  %6222 = vmatprep.subr.mxu1 %v6554_v38 }
0x10be   :  { %6223 = vmatpush3.msra.mxu1 %v6651_v16  ;;  %6226 = vmatprep.mubr.msk.f32.mxu1 %vm6555_vm4, %v6554_v38 }
0x10bf   :  { %v3675_v60 = vand.u32 4294901760, %v3674_v59  ;;  %6224 = vmatprep.subr.mxu1 %v6554_v38 }
0x10c0   :  { %6225 = vmatpush3.msra.mxu1 %v6658_v22 }
0x10c1   :  { %6192 = vmatmul.mubr.f32.vlgmr.msra.gmra.mxu0 %v3675_v60  ;;  %6227 = vmatmul.mubr.f32.vlgmr.msra.gmra.mxu1 %v3671_v56 }
0x10c2   :  { %6202 = vmatpush3.msra.mxu0 %v6661_v26  ;;  %6205 = vmatprep.mubr.msk.f32.mxu0 %vm6555_vm4, %v6554_v38 }
0x10c3   :  { %6203 = vmatprep.subr.mxu0 %v6554_v38  ;;  %6236 = vmatprep.subr.mxu1 %v6554_v38 }
0x10c4   :  { %6204 = vmatpush3.msra.mxu0 %v6665_v31  ;;  %6237 = vmatpush3.msra.mxu1 %v6678_v39 }
0x10c5   :  { %6215 = vmatprep.subr.mxu0 %v6554_v38  ;;  %6206 = vmatmul.mubr.f32.vlgmr.msra.gmra.mxu0 %v3672_v57 }
0x10c6   :  { %6216 = vmatpush3.msra.mxu0 %v6668_v32  ;;  %6219 = vmatprep.mubr.msk.f32.mxu0 %vm6555_vm4, %v6554_v38 }
0x10c7   :  { %6217 = vmatprep.subr.mxu0 %v6554_v38  ;;  %6238 = vmatprep.subr.mxu1 %v6554_v38 }
0x10c8   :  { %6218 = vmatpush3.msra.mxu0 %v6671_v34  ;;  %6239 = vmatpush3.msra.mxu1 %v6683_v41 }
0x10c9   :  { %6220 = vmatmul.mubr.f32.vlgmr.msra.gmra.mxu0 %v3671_v56  ;;  %6240 = vmatprep.mubr.msk.f32.mxu1 %vm6555_vm4, %v6554_v38 }
0x10ca   :  { %6250 = vmatprep.subr.mxu1 %v6554_v38  ;;  %6229 = vmatprep.subr.mxu0 %v6554_v38 }
0x10cb   :  { %6230 = vmatpush3.msra.mxu0 %v6651_v16  ;;  %6233 = vmatprep.mubr.msk.f32.mxu0 %vm6555_vm4, %v6554_v38 }
0x10cc   :  { %6231 = vmatprep.subr.mxu0 %v6554_v38 }
0x10cd   :  { %6232 = vmatpush3.msra.mxu0 %v6658_v22 }
0x10ce   :  { %6243 = vmatprep.subr.mxu0 %v6554_v38 }
0x1179   :  { %v3758_v39 = vpop.f32.mrf.mxu1 }
0x117b   :  { %v6200_v41 = vpop.f32.mrf.mxu1 }
0x117d   :  { %v3909_v61 = vpop.f32.mrf.mxu1 }
0x117f   :  { %v6214_v62 = vpop.f32.mrf.mxu1 }
0x1181   :  { %v3677_v0 = vpop.f32.mrf.mxu0  ;;  %v4059_v1 = vpop.f32.mrf.mxu1 }
0x1182   :  { %v3678_v5 = vadd.f32 %v7036_v4, %v3677_v0 }
0x1183   :  { %v6193_v6 = vpop.f32.mrf.mxu0  ;;  %v6228_v7 = vpop.f32.mrf.mxu1 }
0x1184   :  { %v3759_v8 = vadd.f32 %v3758_v39, %v3678_v5 }
0x1185   :  { %v3834_v9 = vpop.f32.mrf.mxu0 }
0x1186   :  { %v3835_v12 = vadd.f32 %v3834_v9, %v3759_v8 }
0x1187   :  { %v6207_v13 = vpop.f32.mrf.mxu0 }
0x1188   :  { %v3910_v3 = vadd.f32 %v3909_v61, %v3835_v12 }
0x1189   :  { %v3986_v14 = vpop.f32.mrf.mxu0 }
0x118a   :  { %v3987_v15 = vadd.f32 %v3986_v14, %v3910_v3 }
0x118b   :  { %v6221_v17 = vpop.f32.mrf.mxu0 }
0x118c   :  { %v4060_v18 = vadd.f32 %v4059_v1, %v3987_v15  ;;  %v4600_v17 = vld [vmem:[%s7172_s6] sm:$0xff] }
0x118e   :  { %v4064_v19 = vrot.slane %v4060_v18, 4 }
0x1190   :  { %4073 = vrot.lane.b32.xlu1 %v4064_v19, %s6556_s3  ;;  %v4066_v21 = vadd.f32 %v4064_v19, %v6737_v63  ;;  %v4650_v19 = vand.u32 4294901760, %v4600_v17 }
0x1192   :  { %v5691_v23 = vmul.f32 -1.442695, %v4066_v21 }
0x1194   :  { %6405 = vpow2.f32 %v5691_v23 }
0x11a1   :  { %v6406_v24 = vpop.eup %6405 }
0x11a2   :  { %v4070_v25 = vadd.f32 1.0, %v6406_v24 }
0x11a4   :  { %6407 = vrcp.f32 %v4070_v25 }
0x11b1   :  { %v6408_v27 = vpop.eup %6407 }
0x11b2   :  { %v4083_v37 = vsub.f32 1.0, %v6408_v27  ;;  %v4091_v42 = vmul.f32 %v6408_v27, %v4089_v40 }
0x1202   :  { %v4074_v28 = vpop.permute.xlu1 %4073 }
0x1203   :  { %v4076_v29 = vmul.f32 %v6408_v27, %v4074_v28 }
0x1205   :  { %4078 = vrot.lane.b32.xlu0 %v4076_v29, %s6557_s25 }
0x1277   :  { %v4079_v30 = vpop.permute.xlu0 %4078 }
0x1278   :  { %v4081_v35 = vadd.f32 %v4079_v30, %v6737_v63 }
0x127a   :  { %6409 = vtanh.f32 %v4081_v35 }
0x1287   :  { %v6410_v36 = vpop.eup %6409 }
0x1288   :  { %4085 = vrot.lane.b32.xlu1 %v6410_v36, %s6558_s26 }
0x12fa   :  { %v4086_v2 = vpop.permute.xlu1 %4085 }
0x12fb   :  { %v4088_v43 = vmul.f32 %v4086_v2, %v4083_v37 }
0x12fd   :  { %v7045_v44 = vadd.f32 %v4091_v42, %v4088_v43 }
0x12ff   :  { %v4098_v45 = vrot.slane %v7045_v44, 4  ;;  %v4588_v28 = vrot.slane %v7045_v44, 6 }
0x1301   :  { %4099 = vrot.lane.b32.xlu0 %v4098_v45, %s6558_s26 }
0x1373   :  { %v4100_v46 = vpop.permute.xlu0 %4099 }
0x1374   :  { %v4101_v47 = vsel %vm608_vm3, %v4100_v46, 0 }
0x1375   :  { %v4170_v48 = vand.u32 4294901760, %v4101_v47 }
0x1377   :  { %v4171_v49 = vsub.f32 %v4101_v47, %v4170_v48  ;;  %6241 = vmatmul.mubr.f32.vlgmr.msra.gmra.mxu1 %v4170_v48 }
0x1378   :  { %6251 = vmatpush3.msra.mxu1 %v6651_v16  ;;  %6254 = vmatprep.mubr.msk.f32.mxu1 %vm6555_vm4, %v6554_v38 }
0x1379   :  { %v4172_v50 = vand.u32 4294901760, %v4171_v49  ;;  %6252 = vmatprep.subr.mxu1 %v6554_v38 }
0x137a   :  { %6253 = vmatpush3.msra.mxu1 %v6658_v22 }
0x137b   :  { %v4173_v51 = vsub.f32 %v4171_v49, %v4172_v50  ;;  %6255 = vmatmul.mubr.f32.vlgmr.msra.gmra.mxu1 %v4172_v50  ;;  %6264 = vmatprep.subr.mxu1 %v6554_v38 }
0x137c   :  { %6265 = vmatpush3.msra.mxu1 %v6651_v16  ;;  %6268 = vmatprep.mubr.msk.f32.mxu1 %vm6555_vm4, %v6554_v38 }
0x137d   :  { %v4174_v11 = vand.u32 4294901760, %v4173_v51  ;;  %6266 = vmatprep.subr.mxu1 %v6554_v38 }
0x137e   :  { %6267 = vmatpush3.msra.mxu1 %v6658_v22 }
0x137f   :  { %6234 = vmatmul.mubr.f32.vlgmr.msra.gmra.mxu0 %v4174_v11  ;;  %6269 = vmatmul.mubr.f32.vlgmr.msra.gmra.mxu1 %v4170_v48 }
0x1380   :  { %6244 = vmatpush3.msra.mxu0 %v6661_v26  ;;  %6247 = vmatprep.mubr.msk.f32.mxu0 %vm6555_vm4, %v6554_v38 }
0x1381   :  { %6245 = vmatprep.subr.mxu0 %v6554_v38 }
0x1382   :  { %6246 = vmatpush3.msra.mxu0 %v6665_v31 }
0x1383   :  { %6257 = vmatprep.subr.mxu0 %v6554_v38  ;;  %6248 = vmatmul.mubr.f32.vlgmr.msra.gmra.mxu0 %v4171_v49 }
0x1384   :  { %6258 = vmatpush3.msra.mxu0 %v6668_v32  ;;  %6261 = vmatprep.mubr.msk.f32.mxu0 %vm6555_vm4, %v6554_v38 }
0x1385   :  { %6259 = vmatprep.subr.mxu0 %v6554_v38 }
0x1386   :  { %6260 = vmatpush3.msra.mxu0 %v6671_v34 }
0x1387   :  { %6262 = vmatmul.mubr.f32.vlgmr.msra.gmra.mxu0 %v4170_v48 }
0x1437   :  { %v4257_v16 = vpop.f32.mrf.mxu1 }
0x1439   :  { %v6242_v22 = vpop.f32.mrf.mxu1 }
0x143b   :  { %v4408_v26 = vpop.f32.mrf.mxu1 }
0x143d   :  { %v6256_v53 = vpop.f32.mrf.mxu1 }
0x143f   :  { %v4176_v54 = vpop.f32.mrf.mxu0  ;;  %v4558_v55 = vpop.f32.mrf.mxu1 }
0x1440   :  { %v4177_v31 = vadd.f32 %v7036_v4, %v4176_v54  ;;  %v5127_v54 = vld [vmem:[#allocation9 + $0x8] sm:$0x3f] }
0x1441   :  { %v6235_v56 = vpop.f32.mrf.mxu0  ;;  %v6270_v57 = vpop.f32.mrf.mxu1 }
0x1442   :  { %v4258_v58 = vadd.f32 %v4257_v16, %v4177_v31  ;;  %v5126_v56 = vld [vmem:[#allocation9] sm:$0xff] }
0x1443   :  { %v4333_v32 = vpop.f32.mrf.mxu0 }
0x1444   :  { %v4334_v59 = vadd.f32 %v4333_v32, %v4258_v58  ;;  %v7116_v58 = vand.u32 4294901760, %v5126_v56 }
0x1445   :  { %v6249_v60 = vpop.f32.mrf.mxu0 }
0x1446   :  { %v4409_v39 = vadd.f32 %v4408_v26, %v4334_v59  ;;  %v7124_v59 = vsub.f32 %v5126_v56, %v7116_v58 }
0x1447   :  { %v4485_v41 = vpop.f32.mrf.mxu0 }
0x1448   :  { %v4486_v38 = vadd.f32 %v4485_v41, %v4409_v39  ;;  %v7131_v39 = vand.u32 4294901760, %v7124_v59 }
0x1449   :  { %v6263_v61 = vpop.f32.mrf.mxu0 }
0x144a   :  { %v4559_v34 = vadd.f32 %v4558_v55, %v4486_v38  ;;  %v5144_v55 = vsel %vm5142_vm9, %v5127_v54, 0  ;;  %v5272_v38 = vsub.f32 %v7124_v59, %v7131_v39 }
0x144b   :  { %v7111_v31 = vand.u32 4294901760, %v5144_v55 }
0x144c   :  { %v4563_v62 = vrot.slane %v4559_v34, 2  ;;  %v5273_v61 = vand.u32 4294901760, %v5272_v38 }
0x144d   :  { %v7114_v57 = vsub.f32 %v5144_v55, %v7111_v31 }
0x144e   :  { %4572 = vrot.lane.b32.xlu1 %v4563_v62, %s6556_s3  ;;  %v4565_v0 = vadd.f32 %v4563_v62, %v6737_v63 }
0x144f   :  { %v7121_v32 = vand.u32 4294901760, %v7114_v57 }
0x1450   :  { %v5692_v1 = vmul.f32 -1.442695, %v4565_v0  ;;  %v5693_v0 = vld [vmem:[%s7173_s7] ss:$0 sm:$0xff]  ;;  %s6560_s7 = smov [#allocation12]  }
0x1451   :  { %v5265_v60 = vsub.f32 %v7114_v57, %v7121_v32  ;;  %s5668_s13 = sshll.u32 %s6560_s7, 4  ;;  %s5669_s13 = int_to_ptr.vmem [resolvable:$true] %s5668_s13 }
0x1452   :  { %6411 = vpow2.f32 %v5692_v1  ;;  %s6498_s14 = scalar_lea.vmem %s5669_s13, 32  ;;  %p6503_p7 = scmp.lt.s32.totalorder %s5669_s13, %s5669_s13 }
0x1453   :  { %v5266_v41 = vand.u32 4294901760, %v5265_v60  ;;  %p6499_p6 = scmp.ne.s32.totalorder %s5669_s13, %s6498_s14  ;;  %p6504_p8 = scmp.lt.s32.totalorder %s6498_s14, %s6498_s14 }
0x1455   :  { %p6505_p9 = por %p6504_p8, %p6503_p7 }
0x1457   :  { %p6506_p10 = pnand %p6505_p9, %p6499_p6 }
0x145f   :  { %v6412_v5 = vpop.eup %6411 }
0x1460   :  { %v4569_v4 = vadd.f32 1.0, %v6412_v5 }
0x1462   :  { %6413 = vrcp.f32 %v4569_v4 }
0x146f   :  { %v6414_v6 = vpop.eup %6413 }
0x1470   :  { %v4582_v27 = vsub.f32 1.0, %v6414_v6  ;;  %v4590_v35 = vmul.f32 %v6414_v6, %v4588_v28 }
0x14c0   :  { %v4573_v7 = vpop.permute.xlu1 %4572 }
0x14c1   :  { %v4575_v8 = vmul.f32 %v6414_v6, %v4573_v7 }
0x14c3   :  { %4577 = vrot.lane.b32.xlu0 %v4575_v8, %s6557_s25 }
0x14c7   :  { %1602 = vrot.lane.b32.xlu0 %v6799_v33, %s6558_s26 }
0x14cb   :  { %2602 = vrot.lane.b32.xlu0 %v6895_v10, %s6558_s26 }
0x14cf   :  { %4094 = vrot.lane.b32.xlu0 %v7045_v44, %s6558_s26 }
0x1535   :  { %v4578_v9 = vpop.permute.xlu0 %4577 }
0x1536   :  { %v4580_v12 = vadd.f32 %v4578_v9, %v6737_v63  ;;  %v4601_v63 = vld [vmem:[%s7172_s6 + $0x8] sm:$0x1] }
0x1537   :  { %v4616_v14 = vsel %vm612_vm2, %v4601_v63, 0 }
0x1538   :  { %6415 = vtanh.f32 %v4580_v12  ;;  %v4647_v15 = vand.u32 4294901760, %v4616_v14 }
0x1539   :  { %v1603_v13 = vpop.permute.xlu0 %1602 }
0x153a   :  { %1606 = vst.msk [vmem:[#allocation2] sm:$0xc] %vm1605_vm6, %v1603_v13  ;;  %v4735_v18 = vsub.f32 %v4616_v14, %v4647_v15  ;;  %6271 = vmatprep.subr.mxu0 %v4647_v15 }
0x153b   :  { %6272 = vmatpush3.msra.mxu0 %v4647_v15 }
0x153c   :  { %v7098_v21 = vand.u32 4294901760, %v4735_v18  ;;  %6273 = vmatprep.subr.mxu0 %v4650_v19 }
0x153d   :  { %v2603_v3 = vpop.permute.xlu0 %2602  ;;  %6274 = vmatpush3.msra.mxu0 %v4650_v19 }
0x153e   :  { %2606 = vst.msk [vmem:[#allocation2] sm:$0xc0] %vm2605_vm7, %v2603_v3  ;;  %6285 = vmatprep.subr.mxu0 %v4735_v18 }
0x1541   :  { %v4095_v33 = vpop.permute.xlu0 %4094 }
0x1542   :  { %4097 = vst.msk [vmem:[#allocation2 + $0x8] sm:$0x30] %vm2105_vm8, %v4095_v33 }
0x1545   :  { %v6416_v10 = vpop.eup %6415 }
0x1546   :  { %4584 = vrot.lane.b32.xlu1 %v6416_v10, %s6558_s26 }
0x154a   :  { %2102 = vrot.lane.b32.xlu1 %v6847_v20, %s6558_s26  ;;  %v4742_v20 = vsub.f32 %v4600_v17, %v4650_v19 }
0x154c   :  { %v4743_v23 = vand.u32 4294901760, %v4742_v20 }
0x154e   :  { %3595 = vrot.lane.b32.xlu1 %v6995_v52, %s6558_s26  ;;  %v4737_v52 = vsub.f32 %v4735_v18, %v7098_v21  ;;  %v4744_v25 = vsub.f32 %v4742_v20, %v4743_v23 }
0x1550   :  { %v4738_v24 = vand.u32 4294901760, %v4737_v52  ;;  %v4745_v30 = vand.u32 4294901760, %v4744_v25 }
0x1552   :  { %6278 = vmatprep.subr.mxu1 %v4738_v24 }
0x1553   :  { %6279 = vmatpush3.msra.mxu1 %v4738_v24 }
0x1554   :  { %6280 = vmatprep.subr.mxu1 %v4745_v30 }
0x1555   :  { %6281 = vmatpush3.msra.mxu1 %v4745_v30 }
0x1556   :  { %6292 = vmatprep.subr.mxu1 %v4647_v15 }
0x15b8   :  { %v4585_v29 = vpop.permute.xlu1 %4584 }
0x15b9   :  { %v4587_v36 = vmul.f32 %v4585_v29, %v4582_v27 }
0x15bb   :  { %v4591_v37 = vadd.f32 %v4590_v35, %v4587_v36 }
0x15bc   :  { %v2103_v40 = vpop.permute.xlu1 %2102 }
0x15bd   :  { %2106 = vst.msk [vmem:[#allocation2] sm:$0x30] %vm2105_vm8, %v2103_v40  ;;  %4593 = vrot.lane.b32.xlu1 %v4591_v37, %s6558_s26 }
0x15c0   :  { %v3596_v2 = vpop.permute.xlu1 %3595 }
0x15c1   :  { %3598 = vst.msk [vmem:[#allocation2 + $0x8] sm:$0xc] %vm1605_vm6, %v3596_v2 }
0x15c4   :  { %v4598_v42 = vld [vmem:[#allocation2] sm:$0xff] }
0x15c5   :  { %v4610_v43 = vsel %vm608_vm3, %v4598_v42, 0 }
0x15c6   :  { %v4685_v44 = vand.u32 4294901760, %v4610_v43 }
0x15c8   :  { %6282 = vmatprep.mubr.f32.mxu1 %v4685_v44  ;;  %v4686_v45 = vsub.f32 %v4610_v43, %v4685_v44 }
0x15ca   :  { %v4687_v46 = vand.u32 4294901760, %v4686_v45 }
0x15cc   :  { %v4688_v47 = vsub.f32 %v4686_v45, %v4687_v46 }
0x15ce   :  { %v4689_v48 = vand.u32 4294901760, %v4688_v47 }
0x15d0   :  { %6275 = vmatprep.mubr.f32.mxu0 %v4689_v48 }
0x162f   :  { %v4594_v49 = vpop.permute.xlu1 %4593 }
0x1630   :  { %4596 = vst.msk [vmem:[#allocation2 + $0x8] sm:$0xc0] %vm2605_vm7, %v4594_v49  ;;  %4597 = vst.msk [vmem:[#allocation12 - $0x6] sm:$0xc0] %vm2605_vm7, %v4594_v49 }
0x1637   :  { %v4599_v50 = vld [vmem:[#allocation2 + $0x8] sm:$0xff] }
0x1638   :  { %v4613_v51 = vsel %vm608_vm3, %v4599_v50, 0 }
0x1639   :  { %v4695_v11 = vand.u32 4294901760, %v4613_v51 }
0x163b   :  { %v4696_v16 = vsub.f32 %v4613_v51, %v4695_v11  ;;  %6283 = vmatmul.mubr.f32.vlgmr.msra.gmra.mxu1 %v4695_v11 }
0x163c   :  { %6293 = vmatpush3.msra.mxu1 %v4647_v15  ;;  %6296 = vmatprep.mubr.f32.mxu1 %v4687_v46 }
0x163d   :  { %6294 = vmatprep.subr.mxu1 %v4650_v19  ;;  %v4697_v22 = vand.u32 4294901760, %v4696_v16 }
0x163e   :  { %6295 = vmatpush3.msra.mxu1 %v4650_v19 }
0x163f   :  { %6297 = vmatmul.mubr.f32.vlgmr.msra.gmra.mxu1 %v4697_v22  ;;  %6306 = vmatprep.subr.mxu1 %v4647_v15  ;;  %v4698_v26 = vsub.f32 %v4696_v16, %v4697_v22 }
0x1640   :  { %6307 = vmatpush3.msra.mxu1 %v4647_v15  ;;  %6310 = vmatprep.mubr.f32.mxu1 %v4685_v44 }
0x1641   :  { %6308 = vmatprep.subr.mxu1 %v4650_v19  ;;  %v4699_v53 = vand.u32 4294901760, %v4698_v26 }
0x1642   :  { %6309 = vmatpush3.msra.mxu1 %v4650_v19 }
0x1643   :  { %6276 = vmatmul.mubr.f32.vlgmr.msra.gmra.mxu0 %v4699_v53  ;;  %6311 = vmatmul.mubr.f32.vlgmr.msra.gmra.mxu1 %v4695_v11 }
0x1644   :  { %6286 = vmatpush3.msra.mxu0 %v4735_v18  ;;  %6289 = vmatprep.mubr.f32.mxu0 %v4686_v45 }
0x1645   :  { %6287 = vmatprep.subr.mxu0 %v4742_v20  ;;  %6320 = vmatprep.subr.mxu1 %v5266_v41 }
0x1646   :  { %6288 = vmatpush3.msra.mxu0 %v4742_v20  ;;  %6321 = vmatpush3.msra.mxu1 %v5266_v41 }
0x1647   :  { %6299 = vmatprep.subr.mxu0 %v7098_v21  ;;  %6290 = vmatmul.mubr.f32.vlgmr.msra.gmra.mxu0 %v4696_v16 }
0x1648   :  { %6300 = vmatpush3.msra.mxu0 %v7098_v21  ;;  %6303 = vmatprep.mubr.f32.mxu0 %v4685_v44 }
0x1649   :  { %6301 = vmatprep.subr.mxu0 %v4743_v23  ;;  %6322 = vmatprep.subr.mxu1 %v5273_v61 }
0x164a   :  { %6302 = vmatpush3.msra.mxu0 %v4743_v23  ;;  %6323 = vmatpush3.msra.mxu1 %v5273_v61 }
0x164b   :  { %6304 = vmatmul.mubr.f32.vlgmr.msra.gmra.mxu0 %v4695_v11  ;;  %6313 = vmatprep.subr.mxu0 %v7111_v31 }
0x164c   :  { %6314 = vmatpush3.msra.mxu0 %v7111_v31  ;;  %6334 = vmatprep.subr.mxu1 %v7111_v31 }
0x164d   :  { %6315 = vmatprep.subr.mxu0 %v7116_v58 }
0x164e   :  { %6316 = vmatpush3.msra.mxu0 %v7116_v58 }
0x164f   :  { %6327 = vmatprep.subr.mxu0 %v7114_v57 }
0x16fb   :  { %v6284_v34 = vpop.f32.mrf.mxu1 }
0x16fd   :  { %v4782_v62 = vpop.f32.mrf.mxu1 }
0x16ff   :  { %v6298_v1 = vpop.f32.mrf.mxu1 }
0x1701   :  { %v4946_v9 = vpop.f32.mrf.mxu1 }
0x1703   :  { %v6277_v5 = vpop.f32.mrf.mxu0  ;;  %v6312_v14 = vpop.f32.mrf.mxu1 }
0x1704   :  { %v4702_v4 = vadd.f32 %v6277_v5, %v5693_v0 }
0x1705   :  { %v4691_v6 = vpop.f32.mrf.mxu0  ;;  %v5110_v52 = vpop.f32.mrf.mxu1 }
0x1706   :  { %v4692_v7 = vadd.f32 %v5693_v0, %v4691_v6  ;;  %v4789_v8 = vadd.f32 %v6284_v34, %v4702_v4 }
0x1707   :  { %v6291_v12 = vpop.f32.mrf.mxu0 }
0x1708   :  { %v4872_v13 = vadd.f32 %v6291_v12, %v4789_v8  ;;  %v4783_v3 = vadd.f32 %v4782_v62, %v4692_v7 }
0x1709   :  { %v4864_v33 = vpop.f32.mrf.mxu0 }
0x170a   :  { %v4865_v10 = vadd.f32 %v4864_v33, %v4783_v3  ;;  %v4955_v63 = vadd.f32 %v6298_v1, %v4872_v13 }
0x170b   :  { %v6305_v15 = vpop.f32.mrf.mxu0 }
0x170c   :  { %v5038_v17 = vadd.f32 %v6305_v15, %v4955_v63  ;;  %v4947_v18 = vadd.f32 %v4946_v9, %v4865_v10 }
0x170d   :  { %v5031_v19 = vpop.f32.mrf.mxu0 }
0x170e   :  { %v5117_v21 = vadd.f32 %v6312_v14, %v5038_v17  ;;  %v5032_v20 = vadd.f32 %v5031_v19, %v4947_v18 }
0x1710   :  { %vm5121_vm10 = vcmp.ge.f32.partialorder %v5117_v21, 0.0  ;;  %v5123_v23 = vmul.f32 0.01, %v5117_v21  ;;  %v5111_v24 = vadd.f32 %v5110_v52, %v5032_v20 }
0x1712   :  { %v5125_v25 = vsel %vm5121_vm10, %v5117_v21, %v5123_v23  ;;  %vm5120_vm12 = vcmp.ge.f32.partialorder %v5111_v24, 0.0  ;;  %v5122_v27 = vmul.f32 0.01, %v5111_v24 }
0x1713   :  { %v5140_v28 = vsel %vm5135_vm11, %v5125_v25, 0 }
0x1714   :  { %v5124_v29 = vsel %vm5120_vm12, %v5111_v24, %v5122_v27  ;;  %v5223_v30 = vand.u32 4294901760, %v5140_v28 }
0x1715   :  { %v5137_v35 = vsel %vm5135_vm11, %v5124_v29, 0 }
0x1716   :  { %v5213_v36 = vand.u32 4294901760, %v5137_v35  ;;  %v5224_v37 = vsub.f32 %v5140_v28, %v5223_v30 }
0x1718   :  { %6324 = vmatprep.mubr.f32.mxu1 %v5213_v36  ;;  %v5214_v40 = vsub.f32 %v5137_v35, %v5213_v36  ;;  %v5225_v2 = vand.u32 4294901760, %v5224_v37 }
0x1719   :  { %6325 = vmatmul.mubr.f32.vlgmr.msra.gmra.mxu1 %v5223_v30 }
0x171a   :  { %6335 = vmatpush3.msra.mxu1 %v7111_v31  ;;  %v5215_v42 = vand.u32 4294901760, %v5214_v40  ;;  %v5226_v43 = vsub.f32 %v5224_v37, %v5225_v2 }
0x171b   :  { %6336 = vmatprep.subr.mxu1 %v7116_v58 }
0x171c   :  { %6337 = vmatpush3.msra.mxu1 %v7116_v58  ;;  %6338 = vmatprep.mubr.f32.mxu1 %v5215_v42  ;;  %v5216_v44 = vsub.f32 %v5214_v40, %v5215_v42  ;;  %v5227_v46 = vand.u32 4294901760, %v5226_v43 }
0x171d   :  { %6339 = vmatmul.mubr.f32.vlgmr.msra.gmra.mxu1 %v5225_v2  ;;  %6348 = vmatprep.subr.mxu1 %v7111_v31 }
0x171e   :  { %6349 = vmatpush3.msra.mxu1 %v7111_v31  ;;  %6352 = vmatprep.mubr.f32.mxu1 %v5213_v36  ;;  %v5217_v45 = vand.u32 4294901760, %v5216_v44 }
0x171f   :  { %6350 = vmatprep.subr.mxu1 %v7116_v58 }
0x1720   :  { %6317 = vmatprep.mubr.f32.mxu0 %v5217_v45  ;;  %6351 = vmatpush3.msra.mxu1 %v7116_v58 }
0x1721   :  { %6318 = vmatmul.mubr.f32.vlgmr.msra.gmra.mxu0 %v5227_v46  ;;  %6353 = vmatmul.mubr.f32.vlgmr.msra.gmra.mxu1 %v5223_v30 }
0x1722   :  { %6328 = vmatpush3.msra.mxu0 %v7114_v57  ;;  %6331 = vmatprep.mubr.f32.mxu0 %v5214_v40 }
0x1723   :  { %6329 = vmatprep.subr.mxu0 %v7124_v59 }
0x1724   :  { %6330 = vmatpush3.msra.mxu0 %v7124_v59 }
0x1725   :  { %6341 = vmatprep.subr.mxu0 %v7121_v32  ;;  %6332 = vmatmul.mubr.f32.vlgmr.msra.gmra.mxu0 %v5224_v37 }
0x1726   :  { %6342 = vmatpush3.msra.mxu0 %v7121_v32  ;;  %6345 = vmatprep.mubr.f32.mxu0 %v5213_v36 }
0x1727   :  { %6343 = vmatprep.subr.mxu0 %v7131_v39 }
0x1728   :  { %6344 = vmatpush3.msra.mxu0 %v7131_v39 }
0x1729   :  { %6346 = vmatmul.mubr.f32.vlgmr.msra.gmra.mxu0 %v5223_v30 }
0x172a   :  { %6509 = shalt.err (!%p6506_p10)
}
0x172b   :  { %5671 = dma.vmem_to_hbm [thread:$0]  %s5669_s13, 32, %s7177_s11, [#allocation13]   ;;  %v5694_v49 = vld [vmem:[%s7175_s9] ss:$0 sm:$0xff] }
0x172c   :  { %s6561_s11 = smov [#allocation11]  }
0x172d   :  { %s5655_s9 = sshll.u32 %s6561_s11, 4  ;;  %s5656_s9 = int_to_ptr.vmem [resolvable:$true] %s5655_s9 }
0x172e   :  { %s6518_s19 = scalar_lea.vmem %s5656_s9, 256  ;;  %p6523_p12 = scmp.lt.s32.totalorder %s5656_s9, %s5656_s9 }
0x172f   :  { %p6519_p11 = scmp.ne.s32.totalorder %s5656_s9, %s6518_s19  ;;  %p6524_p13 = scmp.lt.s32.totalorder %s6518_s19, %s6518_s19 }
0x1731   :  { %p6525_p0 = por %p6524_p13, %p6523_p12 }
0x1733   :  { %p6526_p1 = pnand %p6525_p0, %p6519_p11 }
0x17d9   :  { %v6326_v47 = vpop.f32.mrf.mxu1 }
0x17db   :  { %v5310_v48 = vpop.f32.mrf.mxu1 }
0x17dd   :  { %v6340_v50 = vpop.f32.mrf.mxu1 }
0x17df   :  { %v5474_v53 = vpop.f32.mrf.mxu1 }
0x17e1   :  { %v6319_v51 = vpop.f32.mrf.mxu0  ;;  %v6354_v32 = vpop.f32.mrf.mxu1 }
0x17e2   :  { %v5230_v11 = vadd.f32 %v6319_v51, %v5694_v49 }
0x17e3   :  { %v5219_v16 = vpop.f32.mrf.mxu0  ;;  %v5638_v34 = vpop.f32.mrf.mxu1 }
0x17e4   :  { %v5220_v22 = vadd.f32 %v5694_v49, %v5219_v16  ;;  %v5317_v26 = vadd.f32 %v6326_v47, %v5230_v11 }
0x17e5   :  { %v6333_v54 = vpop.f32.mrf.mxu0 }
0x17e6   :  { %v5400_v55 = vadd.f32 %v6333_v54, %v5317_v26  ;;  %v5311_v31 = vadd.f32 %v5310_v48, %v5220_v22 }
0x17e7   :  { %v5392_v56 = vpop.f32.mrf.mxu0 }
0x17e8   :  { %v5393_v57 = vadd.f32 %v5392_v56, %v5311_v31  ;;  %v5483_v58 = vadd.f32 %v6340_v50, %v5400_v55 }
0x17e9   :  { %v6347_v59 = vpop.f32.mrf.mxu0 }
0x17ea   :  { %v5566_v60 = vadd.f32 %v6347_v59, %v5483_v58  ;;  %v5475_v39 = vadd.f32 %v5474_v53, %v5393_v57 }
0x17eb   :  { %v5559_v41 = vpop.f32.mrf.mxu0 }
0x17ec   :  { %v5645_v38 = vadd.f32 %v6354_v32, %v5566_v60  ;;  %v5560_v61 = vadd.f32 %v5559_v41, %v5475_v39 }
0x17ee   :  { %5649 = vst [vmem:[#allocation11 + $0x8] sm:$0xff] %v5645_v38  ;;  %v5639_v62 = vadd.f32 %v5638_v34, %v5560_v61 }
0x17f0   :  { %5648 = vst [vmem:[#allocation11] sm:$0xff] %v5639_v62 }
0x17f1   :  { %6529 = shalt.err (!%p6526_p1)
}
0x17f2   :  { %5661 = dma.vmem_to_hbm [thread:$0]  %s5656_s9, 256, %s7176_s10, [#allocation5], %s6552_s1, %s6552_s1, %s6553_s16  }
0x17f3   :  { %6544 = dma.done.wait [#allocation5], 256  }
0x17f4   :  { %6545 = vsyncadd [#allocation5], 4294967040 }
0x17f5   :  { %6546 = dma.done.wait [#allocation13], 32  }
0x17f6   :  { %6547 = vsyncadd [#allocation13], 4294967264 }
0x17f7   :  { %5678 = vsyncpa [#allocation4], 1 }
0x17f8   :  { %5679 = vsyncpa [#allocation7], 1 }
0x17f9   :  { %5680 = vsyncpa [#allocation10], 1 }
0x17fa   :  { %5681 = vsyncpa [#allocation5], 1 }
0x17fb   :  { %5682 = vsyncpa [#allocation13], 1 }

</bundles_post_ra>
